<compile_context>
chip_gen: v7x
topology: tpu7x:2x2x1
jax: 0.10.0
libtpu: 0.0.40
codegen_flags: <defaults>
</compile_context>

<pallas_src>
from functools import partial

import jax
import jax.numpy as jnp
from jax.experimental import pallas as pl
from jax.experimental.pallas import tpu as pltpu

n_features = 75
conv_dim1 = 64
conv_dim2 = 64
conv_dim3 = 64
concat_dim = 64
BN_EPS = 1e-5

NUM_LAYERS = 4
F_PAD = 128                      # lane-dense padding of every feature/channel dim
TILE_STREAM = 256                # row-slab size when A must be streamed (big graphs)
VMEM_CAP_BYTES = 56 * 1024 * 1024  # conservative; v7x has 64 MiB VMEM per TensorCore


def _round_up(x, m):
    return ((x + m - 1) // m) * m


# ----------------------------- Pallas kernel --------------------------------

def gcn_fused_kernel(a_ref, hw0_ref, pool_ref, w_ref, aff_ref,
                     out_ref, hw_a_ref, hw_b_ref, *, tile_n, a_resident):
    l = pl.program_id(0)                 # layer index 0..3
    i = pl.program_id(1)                 # node-row tile index
    last_layer = l == NUM_LAYERS - 1

    # Very first grid step: seed HW_0 = X @ W_0 (computed in the wrapper) into slot A.
    @pl.when(jnp.logical_and(l == 0, i == 0))
    def _():
        hw_a_ref[...] = hw0_ref[...]

    # First step of the last layer: zero the resident output block (pool accumulator).
    @pl.when(jnp.logical_and(last_layer, i == 0))
    def _():
        out_ref[...] = jnp.zeros_like(out_ref)

    # Select this tile's rows of A (static-offset slice when A is VMEM-resident).
    if a_resident:
        row0 = pl.multiple_of(i * tile_n, tile_n)
        a_tile = a_ref[pl.ds(row0, tile_n), :]
    else:
        a_tile = a_ref[...]

    aff = aff_ref[0]                     # [8, C]; rows 0/1/2 = conv bias / BN scale / BN shift
    bias = aff[0:1, :]
    bn_s = aff[1:2, :]
    bn_t = aff[2:3, :]

    def layer_step(src_ref, dst_ref):
        # MXU aggregation: bf16 A rows x resident bf16 HW_l -> f32 accumulate.
        agg = jnp.dot(a_tile, src_ref[...], preferred_element_type=jnp.float32)
        h_new = jnp.maximum(agg + bias, 0.0) * bn_s + bn_t   # bias + ReLU + folded BN (eval)
        h_bf = h_new.astype(jnp.bfloat16)

        # Layers 0..2: compute THIS tile's rows of next layer's HW = h_new @ W_{l+1}
        # (bf16 x bf16 single-pass MXU), written into the other ping-pong buffer.
        @pl.when(jnp.logical_not(last_layer))
        def _():
            nxt = jnp.dot(h_bf, w_ref[0], preferred_element_type=jnp.float32)
            r0 = pl.multiple_of(i * tile_n, tile_n)
            dst_ref[pl.ds(r0, tile_n), :] = nxt.astype(jnp.bfloat16)

        # Last layer: fused global_add_pool accumulated straight into the resident out block.
        @pl.when(last_layer)
        def _():
            out_ref[...] += jnp.dot(pool_ref[...], h_bf,
                                    preferred_element_type=jnp.float32)

    # Ping-pong HW buffers by layer parity (static branches via pl.when; only one runs).
    even = jax.lax.rem(l, 2) == 0

    @pl.when(even)
    def _():
        layer_step(hw_a_ref, hw_b_ref)

    @pl.when(jnp.logical_not(even))
    def _():
        layer_step(hw_b_ref, hw_a_ref)


# ----------------------------- planning / glue --------------------------------

def _vmem_requirement(n_pad, b_pad, c_pad, tile_n, a_resident):
    """Conservative (2-deep buffered) VMEM requirement in bytes."""
    a_block = (n_pad * n_pad) if a_resident else (tile_n * n_pad)
    req = 0
    req += 2 * a_block * 2              # A_hat (bf16)
    req += 2 * n_pad * c_pad * 2        # HW_0 seed input (bf16, resident)
    req += 2 * b_pad * tile_n * 2       # pool slab (bf16)
    req += 2 * c_pad * c_pad * 2        # per-layer weight block (bf16)
    req += 2 * 8 * c_pad * 4            # per-layer affine block (f32)
    req += 2 * b_pad * c_pad * 4        # output block (f32)
    req += 2 * n_pad * c_pad * 2        # ping-pong HW scratch (bf16)
    return req


def _plan(N, B):
    c_pad = F_PAD
    b_pad = max(_round_up(B, 8), 8)
    if N <= 1024:
        # Small-N regime: collapse the row-tile axis (one tile, 4 grid steps total).
        tile_n = max(_round_up(N, 128), 128)
        n_pad = tile_n
    else:
        tile_n = TILE_STREAM            # 256-row slabs feed the 256^2 MXU on v6e/v7x
        n_pad = _round_up(N, tile_n)
    n_tiles = n_pad // tile_n

    a_resident = True
    req = _vmem_requirement(n_pad, b_pad, c_pad, tile_n, a_resident)
    if req > VMEM_CAP_BYTES:
        a_resident = False
        req = _vmem_requirement(n_pad, b_pad, c_pad, tile_n, a_resident)
    if req > VMEM_CAP_BYTES:
        raise ValueError(
            f"VMEM requirement {req} B exceeds cap {VMEM_CAP_BYTES} B; reduce tile size.")
    vmem_limit = int(min(max(2 * req, 32 * 1024 * 1024), VMEM_CAP_BYTES))
    return n_pad, b_pad, c_pad, tile_n, n_tiles, a_resident, vmem_limit


def prepare_inputs(a_hat, x, pool, params, n_pad, b_pad, c_pad):
    """Zero-pad to lane-dense shapes, stack per-layer params, precompute HW_0 = X @ W_0."""
    N = x.shape[0]
    B = pool.shape[0]

    a_p = jnp.zeros((n_pad, n_pad), jnp.float32).at[:N, :N].set(a_hat)
    a_p = a_p.astype(jnp.bfloat16)                       # halve the dominant HBM stream
    x_p = jnp.zeros((n_pad, c_pad), jnp.float32).at[:N, :n_features].set(x)
    pool_p = jnp.zeros((b_pad, n_pad), jnp.float32).at[:B, :N].set(pool)
    pool_p = pool_p.astype(jnp.bfloat16)                 # exact for a 0/1 one-hot matrix

    w_stack_f32 = jnp.zeros((NUM_LAYERS, c_pad, c_pad), jnp.float32)
    aff_stack = jnp.zeros((NUM_LAYERS, 8, c_pad), jnp.float32)
    for l, (w, b, s, t) in enumerate(params):
        fin, fout = w.shape
        w_stack_f32 = w_stack_f32.at[l, :fin, :fout].set(w)
        aff_stack = aff_stack.at[l, 0, :fout].set(b.reshape(-1))
        aff_stack = aff_stack.at[l, 1, :fout].set(s.reshape(-1))
        aff_stack = aff_stack.at[l, 2, :fout].set(t.reshape(-1))

    # Seed HW_0 once in the wrapper (cheap XLA matmul); kernel starts directly on layer 0.
    hw0 = jnp.dot(x_p, w_stack_f32[0], precision=jax.lax.Precision.HIGHEST,
                  preferred_element_type=jnp.float32).astype(jnp.bfloat16)
    w_stack = w_stack_f32.astype(jnp.bfloat16)           # single-pass bf16 MXU transform
    return a_p, hw0, pool_p, w_stack, aff_stack


def gcn_layer_forward(a_hat, x, pool, params):
    """a_hat: [N,N] GCN-normalized adjacency, x: [N,F], pool: [B,N] one-hot,
    params: 4 tuples (W, bias, bn_scale, bn_shift) — all float32."""
    N, B = x.shape[0], pool.shape[0]
    n_pad, b_pad, c_pad, tile_n, n_tiles, a_resident, vmem_limit = _plan(N, B)
    a_p, hw0, pool_p, w_stack, aff_stack = prepare_inputs(
        a_hat, x, pool, params, n_pad, b_pad, c_pad)

    grid = (NUM_LAYERS, n_tiles)

    if a_resident:
        a_spec = pl.BlockSpec((n_pad, n_pad), lambda l, i: (0, 0))       # loaded once
    else:
        a_spec = pl.BlockSpec((tile_n, n_pad), lambda l, i: (i, 0))      # streamed slabs

    out_p = pl.pallas_call(
        partial(gcn_fused_kernel, tile_n=tile_n, a_resident=a_resident),
        out_shape=jax.ShapeDtypeStruct((b_pad, c_pad), jnp.float32),
        grid_spec=pltpu.PrefetchScalarGridSpec(
            num_scalar_prefetch=0,
            grid=grid,
            in_specs=[
                a_spec,
                pl.BlockSpec((n_pad, c_pad), lambda l, i: (0, 0)),       # HW_0 seed (resident)
                # pool: only DMA'd while on the last layer (constant block otherwise)
                pl.BlockSpec((b_pad, tile_n),
                             lambda l, i: (0, jnp.where(l == NUM_LAYERS - 1, i, 0))),
                # W_{l+1} for the epilogue transform (unused on the last layer)
                pl.BlockSpec((1, c_pad, c_pad),
                             lambda l, i: (jnp.minimum(l + 1, NUM_LAYERS - 1), 0, 0)),
                pl.BlockSpec((1, 8, c_pad), lambda l, i: (l, 0, 0)),     # bias / BN affine
            ],
            out_specs=pl.BlockSpec((b_pad, c_pad), lambda l, i: (0, 0)), # resident accumulator
            scratch_shapes=[
                pltpu.VMEM((n_pad, c_pad), jnp.bfloat16),   # HW ping buffer
                pltpu.VMEM((n_pad, c_pad), jnp.bfloat16),   # HW pong buffer
            ],
        ),
        compiler_params=pltpu.CompilerParams(
            # carried VMEM scratch + resident output accumulator require a sequential grid
            dimension_semantics=("arbitrary", "arbitrary"),
            vmem_limit_bytes=vmem_limit,
        ),
    )(a_p, hw0, pool_p, w_stack, aff_stack)

    return out_p[:B, :concat_dim]


# ----------------------------- references ------------------------------------

def reference_forward_matched(a_hat, x, pool, params):
    """Pure-JAX reference with the SAME mixed precision / op order as the kernel."""
    N, B = x.shape[0], pool.shape[0]
    n_pad, b_pad, c_pad, *_ = _plan(N, B)
    a_p, hw0, pool_p, w_stack, aff_stack = prepare_inputs(
        a_hat, x, pool, params, n_pad, b_pad, c_pad)
    hw = hw0
    h_bf = None
    for l in range(NUM_LAYERS):
        agg = jnp.dot(a_p, hw, preferred_element_type=jnp.float32)
        b = aff_stack[l, 0:1, :]
        s = aff_stack[l, 1:2, :]
        t = aff_stack[l, 2:3, :]
        h = jnp.maximum(agg + b, 0.0) * s + t
        h_bf = h.astype(jnp.bfloat16)
        if l < NUM_LAYERS - 1:
            hw = jnp.dot(h_bf, w_stack[l + 1],
                         preferred_element_type=jnp.float32).astype(jnp.bfloat16)
    out = jnp.dot(pool_p, h_bf, preferred_element_type=jnp.float32)
    return out[:B, :concat_dim]


def reference_forward_f32(a_hat, x, pool, params):
    """Full float32 reference (loose sanity check only)."""
    h = x
    for (w, b, s, t) in params:
        h = jnp.maximum(a_hat @ (h @ w) + b, 0.0) * s + t
    return pool @ h


# ----------------------------- setup helpers ---------------------------------

def build_normalized_adjacency(edge_index, num_nodes):
    """Dense GCN-normalized adjacency: D^-1/2 (A + I) D^-1/2."""
    src, dst = edge_index
    a = jnp.zeros((num_nodes, num_nodes), jnp.float32)
    a = a.at[src, dst].set(1.0)
    a = a + jnp.eye(num_nodes, dtype=jnp.float32)          # self loops
    deg = jnp.sum(a, axis=1)
    d_inv_sqrt = jnp.where(deg > 0, 1.0 / jnp.sqrt(deg), 0.0)
    return d_inv_sqrt[:, None] * a * d_inv_sqrt[None, :]


def build_pool_matrix(batch, num_graphs):
    """One-hot [B, N] so that P @ h == global_add_pool(h, batch)."""
    return (batch[None, :] == jnp.arange(num_graphs)[:, None]).astype(jnp.float32)


def init_params(key):
    dims = [(n_features, conv_dim1), (conv_dim1, conv_dim2),
            (conv_dim2, conv_dim3), (conv_dim3, concat_dim)]
    params = []
    for (fin, fout) in dims:
        key, k_w, k_b, k_g, k_be, k_m, k_v = jax.random.split(key, 7)
        w = jax.random.normal(k_w, (fin, fout), jnp.float32) * 0.1   # GCNConv weight
        b = jax.random.normal(k_b, (1, fout), jnp.float32) * 0.01    # GCNConv bias
        gamma = 1.0 + 0.1 * jax.random.normal(k_g, (1, fout), jnp.float32)
        beta = 0.1 * jax.random.normal(k_be, (1, fout), jnp.float32)
        run_mean = 0.1 * jax.random.normal(k_m, (1, fout), jnp.float32)
        run_var = 0.5 + jnp.abs(jax.random.normal(k_v, (1, fout), jnp.float32))
        scale = gamma / jnp.sqrt(run_var + BN_EPS)    # fold eval-mode BN into affine
        shift = beta - run_mean * scale
        params.append((w, b, scale, shift))
    return params


if __name__ == "__main__":
    key = jax.random.PRNGKey(0)

    # 3 small ring graphs of 48 nodes each -> N = 144 nodes (padded to 256, single row tile,
    # A fully VMEM-resident, grid = (4 layers, 1 tile)).
    nodes_per_graph, num_graphs = 48, 3
    N = nodes_per_graph * num_graphs

    src_list, dst_list = [], []
    for g in range(num_graphs):
        off = g * nodes_per_graph
        for i in range(nodes_per_graph):
            j = (i + 1) % nodes_per_graph
            src_list += [off + i, off + j]            # undirected ring edges
            dst_list += [off + j, off + i]
    edge_index = (jnp.array(src_list, jnp.int32), jnp.array(dst_list, jnp.int32))
    batch = jnp.repeat(jnp.arange(num_graphs, dtype=jnp.int32), nodes_per_graph)

    key, k_x = jax.random.split(key)
    x = jax.random.normal(k_x, (N, n_features), jnp.float32)

    a_hat = build_normalized_adjacency(edge_index, N)
    pool = build_pool_matrix(batch, num_graphs)
    params = init_params(key)

    out = gcn_layer_forward(a_hat, x, pool, params)
    out = jax.block_until_ready(out)
    assert out.shape == (num_graphs, concat_dim)

    ref = reference_forward_matched(a_hat, x, pool, params)
    assert jnp.allclose(out, ref, atol=1e-2, rtol=1e-2), "mismatch vs matched-precision reference"

    ref_f32 = reference_forward_f32(a_hat, x, pool, params)
    assert jnp.allclose(out, ref_f32, atol=1.0, rtol=0.1), "gross mismatch vs f32 reference"

    print("KERNEL_OK")
</pallas_src>

<mosaic_0001>
module attributes {stable_mosaic.version = 11 : i64} {
  func.func @gcn_fused_kernel(%arg0: i32, %arg1: i32, %arg2: memref<256x256xbf16, #tpu.memory_space<vmem>>, %arg3: memref<256x128xbf16, #tpu.memory_space<vmem>>, %arg4: memref<8x256xbf16, #tpu.memory_space<vmem>>, %arg5: memref<1x128x128xbf16, #tpu.memory_space<vmem>>, %arg6: memref<1x8x128xf32, #tpu.memory_space<vmem>>, %arg7: memref<8x128xf32, #tpu.memory_space<vmem>>, %arg8: memref<256x128xbf16, #tpu.memory_space<vmem>>, %arg9: memref<256x128xbf16, #tpu.memory_space<vmem>>) attributes {dimension_semantics = [#tpu.dimension_semantics<arbitrary>, #tpu.dimension_semantics<arbitrary>], iteration_bounds = array<i64: 4, 1>, scalar_prefetch = 0 : i64, scratch_operands = 2 : i64, tpu.core_type = #tpu.core_type<tc>, window_params = [{pipeline_mode = #tpu.pipeline_mode<synchronous>, transform_indices = @transform_0, window_bounds = array<i64: 256, 256>}, {pipeline_mode = #tpu.pipeline_mode<synchronous>, transform_indices = @transform_1, window_bounds = array<i64: 256, 128>}, {transform_indices = @transform_2, window_bounds = array<i64: 8, 256>}, {transform_indices = @transform_3, window_bounds = array<i64: 1, 128, 128>}, {transform_indices = @transform_4, window_bounds = array<i64: 1, 8, 128>}, {pipeline_mode = #tpu.pipeline_mode<synchronous>, transform_indices = @transform_5, window_bounds = array<i64: 8, 128>}]} {
    %c3_i32 = arith.constant 3 : i32
    %0 = arith.cmpi eq, %arg0, %c3_i32 : i32
    %c0_i32 = arith.constant 0 : i32
    %1 = arith.cmpi eq, %arg0, %c0_i32 : i32
    %c0_i32_0 = arith.constant 0 : i32
    %2 = arith.cmpi eq, %arg1, %c0_i32_0 : i32
    %3 = arith.andi %1, %2 : i1
    %4 = arith.extui %3 : i1 to i32
    %c0_i32_1 = arith.constant 0 : i32
    %5 = arith.cmpi ne, %4, %c0_i32_1 : i32
    scf.if %5 {
      %c0_10 = arith.constant 0 : index
      %c0_11 = arith.constant 0 : index
      %26 = vector.load %arg3[%c0_10, %c0_11] : memref<256x128xbf16, #tpu.memory_space<vmem>>, vector<256x128xbf16>
      %c0_12 = arith.constant 0 : index
      %c0_13 = arith.constant 0 : index
      %27 = vector.load %arg8[%c0_12, %c0_13] : memref<256x128xbf16, #tpu.memory_space<vmem>>, vector<256x128xbf16>
      tpu.vector_store %arg8[%c0_12, %c0_13], %26 {strides = array<i32>} : memref<256x128xbf16, #tpu.memory_space<vmem>>, vector<256x128xbf16>,
    } else {
    }
    %c0_i32_2 = arith.constant 0 : i32
    %6 = arith.cmpi eq, %arg1, %c0_i32_2 : i32
    %7 = arith.andi %0, %6 : i1
    %8 = arith.extui %7 : i1 to i32
    %c0_i32_3 = arith.constant 0 : i32
    %9 = arith.cmpi ne, %8, %c0_i32_3 : i32
    scf.if %9 {
      %cst = arith.constant 0.000000e+00 : f32
      %26 = vector.broadcast %cst : f32 to vector<8x128xf32>
      %c0_10 = arith.constant 0 : index
      %c0_11 = arith.constant 0 : index
      %27 = vector.load %arg7[%c0_10, %c0_11] : memref<8x128xf32, #tpu.memory_space<vmem>>, vector<8x128xf32>
      tpu.vector_store %arg7[%c0_10, %c0_11], %26 {strides = array<i32>} : memref<8x128xf32, #tpu.memory_space<vmem>>, vector<8x128xf32>,
    } else {
    }
    %c256_i32 = arith.constant 256 : i32
    %10 = arith.muli %arg1, %c256_i32 : i32
    %11 = tpu.assume_multiple %10, 256 : i32
    %12 = arith.index_cast %11 : i32 to index
    %c0 = arith.constant 0 : index
    %13 = vector.load %arg2[%12, %c0] : memref<256x256xbf16, #tpu.memory_space<vmem>>, vector<256x256xbf16>
    %c0_4 = arith.constant 0 : index
    %c0_5 = arith.constant 0 : index
    %c0_6 = arith.constant 0 : index
    %14 = vector.load %arg6[%c0_4, %c0_5, %c0_6] : memref<1x8x128xf32, #tpu.memory_space<vmem>>, vector<1x8x128xf32>
    %15 = vector.shape_cast %14 : vector<1x8x128xf32> to vector<8x128xf32>
    %16 = vector.extract_strided_slice %15 {offsets = [0, 0], sizes = [1, 128], strides = [1, 1]} : vector<8x128xf32> to vector<1x128xf32>
    %17 = vector.extract_strided_slice %15 {offsets = [1, 0], sizes = [1, 128], strides = [1, 1]} : vector<8x128xf32> to vector<1x128xf32>
    %18 = vector.extract_strided_slice %15 {offsets = [2, 0], sizes = [1, 128], strides = [1, 1]} : vector<8x128xf32> to vector<1x128xf32>
    %c2_i32 = arith.constant 2 : i32
    %19 = arith.remsi %arg0, %c2_i32 : i32
    %c0_i32_7 = arith.constant 0 : i32
    %20 = arith.cmpi eq, %19, %c0_i32_7 : i32
    %21 = arith.extui %20 : i1 to i32
    %c0_i32_8 = arith.constant 0 : i32
    %22 = arith.cmpi ne, %21, %c0_i32_8 : i32
    scf.if %22 {
      %c0_10 = arith.constant 0 : index
      %c0_11 = arith.constant 0 : index
      %26 = vector.load %arg8[%c0_10, %c0_11] : memref<256x128xbf16, #tpu.memory_space<vmem>>, vector<256x128xbf16>
      %cst = arith.constant dense<0.000000e+00> : vector<256x128xf32>
      %27 = tpu.matmul %13, %26, %cst {dimension_numbers = #tpu.dot_dimension_numbers<[1], [0], [0], [1], [0, 0, 1, 1], [], []>} : vector<256x256xbf16>, vector<256x128xbf16>, vector<256x128xf32> -> vector<256x128xf32>
      %28 = vector.broadcast %16 : vector<1x128xf32> to vector<256x128xf32>
      %29 = arith.addf %27, %28 : vector<256x128xf32>
      %cst_12 = arith.constant 0.000000e+00 : f32
      %30 = vector.broadcast %cst_12 : f32 to vector<256x128xf32>
      %31 = arith.maximumf %29, %30 : vector<256x128xf32>
      %32 = vector.broadcast %17 : vector<1x128xf32> to vector<256x128xf32>
      %33 = arith.mulf %31, %32 : vector<256x128xf32>
      %34 = vector.broadcast %18 : vector<1x128xf32> to vector<256x128xf32>
      %35 = arith.addf %33, %34 : vector<256x128xf32>
      %36 = arith.truncf %35 : vector<256x128xf32> to vector<256x128xbf16>
      %true_13 = arith.constant true
      %37 = arith.xori %0, %true_13 : i1
      %38 = arith.extui %37 : i1 to i32
      %c0_i32_14 = arith.constant 0 : i32
      %39 = arith.cmpi ne, %38, %c0_i32_14 : i32
      scf.if %39 {
        %c0_16 = arith.constant 0 : index
        %c0_17 = arith.constant 0 : index
        %c0_18 = arith.constant 0 : index
        %42 = vector.load %arg5[%c0_16, %c0_17, %c0_18] : memref<1x128x128xbf16, #tpu.memory_space<vmem>>, vector<1x128x128xbf16>
        %43 = vector.shape_cast %42 : vector<1x128x128xbf16> to vector<128x128xbf16>
        %cst_19 = arith.constant dense<0.000000e+00> : vector<256x128xf32>
        %44 = tpu.matmul %36, %43, %cst_19 {dimension_numbers = #tpu.dot_dimension_numbers<[1], [0], [0], [1], [0, 0, 1, 1], [], []>} : vector<256x128xbf16>, vector<128x128xbf16>, vector<256x128xf32> -> vector<256x128xf32>
        %c256_i32_20 = arith.constant 256 : i32
        %45 = arith.muli %arg1, %c256_i32_20 : i32
        %46 = tpu.assume_multiple %45, 256 : i32
        %47 = arith.truncf %44 : vector<256x128xf32> to vector<256x128xbf16>
        %48 = arith.index_cast %46 : i32 to index
        %c0_21 = arith.constant 0 : index
        %49 = vector.load %arg9[%48, %c0_21] : memref<256x128xbf16, #tpu.memory_space<vmem>>, vector<256x128xbf16>
        tpu.vector_store %arg9[%48, %c0_21], %47 {strides = array<i32>} : memref<256x128xbf16, #tpu.memory_space<vmem>>, vector<256x128xbf16>,
      } else {
      }
      %40 = arith.extui %0 : i1 to i32
      %c0_i32_15 = arith.constant 0 : i32
      %41 = arith.cmpi ne, %40, %c0_i32_15 : i32
      scf.if %41 {
        %c0_16 = arith.constant 0 : index
        %c0_17 = arith.constant 0 : index
        %42 = vector.load %arg7[%c0_16, %c0_17] : memref<8x128xf32, #tpu.memory_space<vmem>>, vector<8x128xf32>
        %c0_18 = arith.constant 0 : index
        %c0_19 = arith.constant 0 : index
        %43 = vector.load %arg4[%c0_18, %c0_19] : memref<8x256xbf16, #tpu.memory_space<vmem>>, vector<8x256xbf16>
        %cst_20 = arith.constant dense<0.000000e+00> : vector<8x128xf32>
        %44 = tpu.matmul %43, %36, %cst_20 {dimension_numbers = #tpu.dot_dimension_numbers<[1], [0], [0], [1], [0, 0, 1, 1], [], []>} : vector<8x256xbf16>, vector<256x128xbf16>, vector<8x128xf32> -> vector<8x128xf32>
        %45 = arith.addf %42, %44 : vector<8x128xf32>
        %c0_21 = arith.constant 0 : index
        %c0_22 = arith.constant 0 : index
        %46 = vector.load %arg7[%c0_21, %c0_22] : memref<8x128xf32, #tpu.memory_space<vmem>>, vector<8x128xf32>
        tpu.vector_store %arg7[%c0_21, %c0_22], %45 {strides = array<i32>} : memref<8x128xf32, #tpu.memory_space<vmem>>, vector<8x128xf32>,
      } else {
      }
    } else {
    }
    %true = arith.constant true
    %23 = arith.xori %20, %true : i1
    %24 = arith.extui %23 : i1 to i32
    %c0_i32_9 = arith.constant 0 : i32
    %25 = arith.cmpi ne, %24, %c0_i32_9 : i32
    scf.if %25 {
      %c0_10 = arith.constant 0 : index
      %c0_11 = arith.constant 0 : index
      %26 = vector.load %arg9[%c0_10, %c0_11] : memref<256x128xbf16, #tpu.memory_space<vmem>>, vector<256x128xbf16>
      %cst = arith.constant dense<0.000000e+00> : vector<256x128xf32>
      %27 = tpu.matmul %13, %26, %cst {dimension_numbers = #tpu.dot_dimension_numbers<[1], [0], [0], [1], [0, 0, 1, 1], [], []>} : vector<256x256xbf16>, vector<256x128xbf16>, vector<256x128xf32> -> vector<256x128xf32>
      %28 = vector.broadcast %16 : vector<1x128xf32> to vector<256x128xf32>
      %29 = arith.addf %27, %28 : vector<256x128xf32>
      %cst_12 = arith.constant 0.000000e+00 : f32
      %30 = vector.broadcast %cst_12 : f32 to vector<256x128xf32>
      %31 = arith.maximumf %29, %30 : vector<256x128xf32>
      %32 = vector.broadcast %17 : vector<1x128xf32> to vector<256x128xf32>
      %33 = arith.mulf %31, %32 : vector<256x128xf32>
      %34 = vector.broadcast %18 : vector<1x128xf32> to vector<256x128xf32>
      %35 = arith.addf %33, %34 : vector<256x128xf32>
      %36 = arith.truncf %35 : vector<256x128xf32> to vector<256x128xbf16>
      %true_13 = arith.constant true
      %37 = arith.xori %0, %true_13 : i1
      %38 = arith.extui %37 : i1 to i32
      %c0_i32_14 = arith.constant 0 : i32
      %39 = arith.cmpi ne, %38, %c0_i32_14 : i32
      scf.if %39 {
        %c0_16 = arith.constant 0 : index
        %c0_17 = arith.constant 0 : index
        %c0_18 = arith.constant 0 : index
        %42 = vector.load %arg5[%c0_16, %c0_17, %c0_18] : memref<1x128x128xbf16, #tpu.memory_space<vmem>>, vector<1x128x128xbf16>
        %43 = vector.shape_cast %42 : vector<1x128x128xbf16> to vector<128x128xbf16>
        %cst_19 = arith.constant dense<0.000000e+00> : vector<256x128xf32>
        %44 = tpu.matmul %36, %43, %cst_19 {dimension_numbers = #tpu.dot_dimension_numbers<[1], [0], [0], [1], [0, 0, 1, 1], [], []>} : vector<256x128xbf16>, vector<128x128xbf16>, vector<256x128xf32> -> vector<256x128xf32>
        %c256_i32_20 = arith.constant 256 : i32
        %45 = arith.muli %arg1, %c256_i32_20 : i32
        %46 = tpu.assume_multiple %45, 256 : i32
        %47 = arith.truncf %44 : vector<256x128xf32> to vector<256x128xbf16>
        %48 = arith.index_cast %46 : i32 to index
        %c0_21 = arith.constant 0 : index
        %49 = vector.load %arg8[%48, %c0_21] : memref<256x128xbf16, #tpu.memory_space<vmem>>, vector<256x128xbf16>
        tpu.vector_store %arg8[%48, %c0_21], %47 {strides = array<i32>} : memref<256x128xbf16, #tpu.memory_space<vmem>>, vector<256x128xbf16>,
      } else {
      }
      %40 = arith.extui %0 : i1 to i32
      %c0_i32_15 = arith.constant 0 : i32
      %41 = arith.cmpi ne, %40, %c0_i32_15 : i32
      scf.if %41 {
        %c0_16 = arith.constant 0 : index
        %c0_17 = arith.constant 0 : index
        %42 = vector.load %arg7[%c0_16, %c0_17] : memref<8x128xf32, #tpu.memory_space<vmem>>, vector<8x128xf32>
        %c0_18 = arith.constant 0 : index
        %c0_19 = arith.constant 0 : index
        %43 = vector.load %arg4[%c0_18, %c0_19] : memref<8x256xbf16, #tpu.memory_space<vmem>>, vector<8x256xbf16>
        %cst_20 = arith.constant dense<0.000000e+00> : vector<8x128xf32>
        %44 = tpu.matmul %43, %36, %cst_20 {dimension_numbers = #tpu.dot_dimension_numbers<[1], [0], [0], [1], [0, 0, 1, 1], [], []>} : vector<8x256xbf16>, vector<256x128xbf16>, vector<8x128xf32> -> vector<8x128xf32>
        %45 = arith.addf %42, %44 : vector<8x128xf32>
        %c0_21 = arith.constant 0 : index
        %c0_22 = arith.constant 0 : index
        %46 = vector.load %arg7[%c0_21, %c0_22] : memref<8x128xf32, #tpu.memory_space<vmem>>, vector<8x128xf32>
        tpu.vector_store %arg7[%c0_21, %c0_22], %45 {strides = array<i32>} : memref<8x128xf32, #tpu.memory_space<vmem>>, vector<8x128xf32>,
      } else {
      }
    } else {
    }
    return
  }
  func.func @transform_0(%arg0: i32, %arg1: i32) -> (i32, i32) {
    %c0_i32 = arith.constant 0 : i32
    %c0_i32_0 = arith.constant 0 : i32
    %c0_i32_1 = arith.constant 0 : i32
    return %c0_i32, %c0_i32_0 : i32, i32
  }
  func.func @transform_1(%arg0: i32, %arg1: i32) -> (i32, i32) {
    %c0_i32 = arith.constant 0 : i32
    %c0_i32_0 = arith.constant 0 : i32
    %c0_i32_1 = arith.constant 0 : i32
    return %c0_i32, %c0_i32_0 : i32, i32
  }
  func.func @transform_2(%arg0: i32, %arg1: i32) -> (i32, i32) {
    %c3_i32 = arith.constant 3 : i32
    %0 = arith.cmpi eq, %arg0, %c3_i32 : i32
    %c0_i32 = arith.constant 0 : i32
    %1 = arith.select %0, %arg1, %c0_i32 : i32
    %c0_i32_0 = arith.constant 0 : i32
    %c0_i32_1 = arith.constant 0 : i32
    return %c0_i32_0, %1 : i32, i32
  }
  func.func @transform_3(%arg0: i32, %arg1: i32) -> (i32, i32, i32) {
    %c1_i32 = arith.constant 1 : i32
    %0 = arith.addi %arg0, %c1_i32 : i32
    %c3_i32 = arith.constant 3 : i32
    %1 = arith.minsi %0, %c3_i32 : i32
    %c0_i32 = arith.constant 0 : i32
    %c0_i32_0 = arith.constant 0 : i32
    %c0_i32_1 = arith.constant 0 : i32
    return %1, %c0_i32, %c0_i32_0 : i32, i32, i32
  }
  func.func @transform_4(%arg0: i32, %arg1: i32) -> (i32, i32, i32) {
    %c0_i32 = arith.constant 0 : i32
    %c0_i32_0 = arith.constant 0 : i32
    %c0_i32_1 = arith.constant 0 : i32
    return %arg0, %c0_i32, %c0_i32_0 : i32, i32, i32
  }
  func.func @transform_5(%arg0: i32, %arg1: i32) -> (i32, i32) {
    %c0_i32 = arith.constant 0 : i32
    %c0_i32_0 = arith.constant 0 : i32
    %c0_i32_1 = arith.constant 0 : i32
    return %c0_i32, %c0_i32_0 : i32, i32
  }
}

</mosaic_0001>

<bundles_post_ra>
// kernel: tpu_custom_call.1
= control target key start
LH: loop header
LB: loop body
LE: loop exit
PB: predicated region body
PF: predicated region fallthrough
CT: control target
= control target key end

     0   :  { %s4245_s0 = inlined_call_operand.hbm [shape: bf16[256,256], index: 0, kind: input, shape index: {}]   ;;  %s4246_s1 = inlined_call_operand.hbm [shape: bf16[256,128], index: 1, kind: input, shape index: {}]   ;;  %s4247_s2 = inlined_call_operand.hbm [shape: bf16[8,256], index: 2, kind: input, shape index: {}]   ;;  %s4248_s3 = inlined_call_operand.hbm [shape: bf16[4,128,128], index: 3, kind: input, shape index: {}]   ;;  %s4249_s4 = inlined_call_operand.hbm [shape: f32[4,8,128], index: 4, kind: input, shape index: {}]   ;;  %s4250_s5 = inlined_call_operand.hbm [shape: f32[8,128], index: 5, kind: output, shape index: {}]  }
   0x1   :  { %4277 = sst [smem:[#allocation27_spill]] %s4245_s0 }
   0x2   :  { %4278 = sst [smem:[#allocation28_spill]] %s4247_s2 }
   0x3   :  { %4279 = sst [smem:[#allocation29_spill]] %s4248_s3 }
   0x4   :  { %4280 = sst [smem:[#allocation30_spill]] %s4250_s5 }
   0x5   :  { %10 = vsyncpa [#allocation5], 0 }
   0x6   :  { %11 = vsyncpa [#allocation8], 0 }
   0x7   :  { %12 = vsyncpa [#allocation6], 0  ;;  %s3340_s18 = smov 0   ;;  %s3342_s19 = smov 0  }
   0x8   :  { %s3344_s20 = smov 0   ;;  %s3346_s21 = smov 0  }
   0x9   :  { %s3348_s22 = smov 0   ;;  %s3350_s23 = smov 0  }
   0xa   :  { %s3352_s24 = smov 0   ;;  %s3354_s25 = smov 0  }
   0xb   :  { %s3356_s26 = smov 0  }
   0xc LB: > { %s3384_s27 = sadd.s32 4294967295, %s3297_s26   ;;  %p128_p0 = scmp.ne.s32.totalorder %s3281_s22, %s3277_s21  ;;  %s3297_s26 = sphi %s3356_s26, %s18_s26   ;;  %s3293_s25 = sphi %s3354_s25, %s4337_s25   ;;  %s3289_s24 = sphi %s3352_s24, %s4336_s24   ;;  %s3285_s23 = sphi %s3350_s23, %s4335_s23   ;;  %s3281_s22 = sphi %s3348_s22, %s4334_s22   ;;  %s3277_s21 = sphi %s3346_s21, %s4333_s21   ;;  %s3273_s20 = sphi %s3344_s20, %s4332_s20   ;;  %s3269_s19 = sphi %s3342_s19, %s4331_s19   ;;  %s3265_s18 = sphi %s3340_s18, %s4330_s18  }
   0xd   : > { %p4251_p1 = scmp.eq.s32.totalorder %s3384_s27, 0  ;;  %p2262_p2 = scmp.ge.s32.totalorder %s3297_s26, 1 }
   0xe   : > { %p186_p3 = scmp.lt.s32.totalorder %s3297_s26, 5  ;;  %s3299_s30 = smov [#allocation4]  }
   0xf   : > { %p3392_p4 = por %p4251_p1, %p128_p0  ;;  %s198_s6 = sshll.u32 %s3299_s30, 4  ;;  %s199_s6 = int_to_ptr.vmem [resolvable:$true] %s198_s6 }
  0x10   : > { %p3396_p5 = pnand %p2262_p2, %p186_p3  ;;  %s4284_s0 = sld [smem:[#allocation27_spill]] }
  0x11   : > { %s4281_s28 = scalar_select %p3392_p4, 1, 0 }
  0x12   : > { %s4282_s29 = scalar_select %p3396_p5, 1, 0 }
  0x13   : > { %p2890_p6 = pneg %p3396_p5 }
  0x15   : > { %p3404_p7 = pnand %p2890_p6, %p4251_p1 }
  0x16   : > { %s3033_s10 = scalar_lea.hbm %s4284_s0, 4096 }
  0x17   : > { %s4283_s7 = scalar_select %p3404_p7, 1, 0 }
  0x18   : > { %p3034_p10 = scmp.ne.s32.totalorder %s4284_s0, %s3033_s10  ;;  %p4255_p11 = pneg %p3404_p7 }
  0x19   : > { %p3040_p0 = scmp.lt.u32.totalorder %s3033_s10, %s4284_s0 }
  0x1a   : > { %p3036_p12 = pnand %p4255_p11, %p3034_p10 }
  0x1c   : > { %p3037_p13 = pneg %p3036_p12 }
  0x1e   : > { %p3042_p2 = pnand %p3040_p0, %p3037_p13 }
  0x20   : > { %3045 = shalt.err (!%p3042_p2)
}
  0x21   : > { %s3046_s15 = scalar_lea.vmem %s199_s6, 4096  ;;  %p3054_p8 = scmp.lt.s32.totalorder %s199_s6, %s199_s6 }
  0x22   : > { %p3047_p3 = scmp.ne.s32.totalorder %s199_s6, %s3046_s15  ;;  %p3055_p9 = scmp.lt.s32.totalorder %s3046_s15, %s3046_s15 }
  0x24   : > { %p3049_p6 = pnand %p3047_p3, %p4255_p11  ;;  %p3056_p4 = por %p3055_p9, %p3054_p8 }
  0x26   : > { %p3050_p1 = pneg %p3049_p6 }
  0x28   : > { %p3057_p5 = pnand %p3056_p4, %p3050_p1 }
  0x2a   : > { %3060 = shalt.err (!%p3057_p5)
}
  0x2b   : > { %s3300_s16 = smov 128   ;;  %s3301_s17 = smov 8  }
  0x2c   : > { %2893 = dma.hbm_to_vmem [thread:$0]  (!%p3404_p7), %s4284_s0, 4096, %s199_s6, [#allocation5], %s3300_s16, %s3300_s16, %s3301_s17  }
  0x2d   : > { %p4285_p10 = scmp.ne.s32.totalorder %s3285_s23, %s3281_s22  ;;  %p4286_p8 = scmp.eq.s32.totalorder %s3297_s26, 0 }
  0x2e   : > { %p4254_p4 = scmp.lt.s32.totalorder %s3297_s26, 4  ;;  %s225_s8 = sand.u32 1, %s3297_s26  }
  0x2f   : > { %p124_p1 = por %p4286_p8, %p4285_p10  ;;  %s3302_s9 = smov [#allocation9]  }
  0x30   : > { %s239_s10 = sshll.u32 %s3302_s9, 4  ;;  %p4287_p5 = pmov %p4286_p8  ;;  %s240_s10 = int_to_ptr.vmem [resolvable:$true] %s239_s10 }
  0x31   : > { %p3450_p12 = pnand %p4254_p4, %p124_p1  ;;  %s3454_s6 = scalar_lea.sflag [#allocation5], %s225_s8 }
  0x32   : > { %p3444_p9 = pnand %p4254_p4, %p4287_p5  ;;  %s4290_s2 = sld [smem:[#allocation28_spill]] }
  0x33   : > { %s4289_s12 = scalar_select %p3450_p12, 1, 0 }
  0x34   : > { %p3063_p0 = pneg %p3444_p9 }
  0x38   : > { %s3061_s15 = scalar_lea.hbm %s4290_s2, 128 }
  0x39   : > { %p3062_p13 = scmp.ne.s32.totalorder %s4290_s2, %s3061_s15  ;;  %p3068_p6 = scmp.lt.u32.totalorder %s3061_s15, %s4290_s2 }
  0x3b   : > { %p3064_p2 = pnand %p3063_p0, %p3062_p13 }
  0x3d   : > { %p3065_p3 = pneg %p3064_p2 }
  0x3f   : > { %p3070_p10 = pnand %p3068_p6, %p3065_p3 }
  0x41   : > { %3073 = shalt.err (!%p3070_p10)
}
  0x42   : > { %s3074_s8 = scalar_lea.vmem %s240_s10, 128  ;;  %s3081_s9 = scalar_lea.vmem %s240_s10, 256 }
  0x43   : > { %p3075_p8 = scmp.ne.s32.totalorder %s240_s10, %s3074_s8  ;;  %p3082_p4 = scmp.lt.s32.totalorder %s240_s10, %s240_s10 }
  0x44   : > { %p3083_p11 = scmp.lt.s32.totalorder %s3081_s9, %s3074_s8 }
  0x45   : > { %p3077_p1 = pnand %p3075_p8, %p3063_p0 }
  0x46   : > { %p3084_p7 = por %p3083_p11, %p3082_p4 }
  0x47   : > { %p3078_p5 = pneg %p3077_p1 }
  0x49   : > { %p3085_p12 = pnand %p3084_p7, %p3078_p5 }
  0x4b   : > { %3088 = shalt.err (!%p3085_p12)
}
  0x4c   : > { %2900 = dma.hbm_to_vmem [thread:$0]  (!%p3444_p9), %s4290_s2, 128, %s240_s10, %s3454_s6  }
  0x4d   : > { %s30_s15 = sadd.s32 1, %s3293_s25  ;;  %s248_s11 = sand.u32 1, %s3285_s23  }
  0x4e   : > { %p32_p13 = scmp.ge.s32.totalorder %s30_s15, 4  ;;  %p107_p0 = scmp.lt.s32.totalorder %s30_s15, 3 }
  0x4f   : > { %s2267_s30 = sshll.u32 %s248_s11, 6  ;;  %s4291_s3 = sld [smem:[#allocation29_spill]] }
  0x50   : > { %s3475_s17 = scalar_select %p32_p13, 0, %s30_s15  }
  0x51   : > { %s4339_s15 = smov (!%p107_p0, %s30_s15), 3  ;;  %s250_s16 = scalar_lea.vmem [#allocation10], %s2267_s30 }
  0x52   : > { %s109_s21 = sadd.s32 1, %s3475_s17  ;;  %s2391_s8 = sshll.u32 %s4339_s15, 10 }
  0x53   : > { %p110_p7 = scmp.lt.s32.totalorder %s109_s21, 3  ;;  %s260_s0 = sshll.u32 %s250_s16, 4  ;;  %s3488_s0 = int_to_ptr.vmem [resolvable:$true] %s260_s0 }
  0x54   : > { %p4293_p9 = scmp.ne.s32.totalorder %s4289_s12, 0 }
  0x55   : > { %s4341_s21 = smov (!%p110_p7, %s109_s21), 3  ;;  %s3482_s10 = scalar_lea.hbm %s4291_s3, %s2391_s8 }
  0x56   : > { %s112_s14 = ssub.s32 %s4339_s15, %s4341_s21  ;;  %s3089_s11 = scalar_lea.hbm %s3482_s10, 1024 }
  0x57   : > { %p3484_p11 = scmp.eq.s32.totalorder %s112_s14, 0  ;;  %p3090_p4 = scmp.ne.s32.totalorder %s3482_s10, %s3089_s11 }
  0x58   : > { %p3091_p12 = pneg %p4293_p9  ;;  %s3094_s15 = scalar_lea.hbm %s4291_s3, 4096 }
  0x59   : > { %p3095_p6 = scmp.lt.u32.totalorder %s3482_s10, %s4291_s3  ;;  %p3096_p10 = scmp.lt.u32.totalorder %s3094_s15, %s3089_s11 }
  0x5a   : > { %p3092_p2 = pnand %p3091_p12, %p3090_p4  ;;  %p3098_p1 = scmp.lt.u32.totalorder %s3089_s11, %s3482_s10 }
  0x5b   : > { %p3097_p8 = por %p3096_p10, %p3095_p6 }
  0x5c   : > { %p3093_p3 = pneg %p3092_p2 }
  0x5d   : > { %p3099_p5 = por %p3098_p1, %p3097_p8 }
  0x5f   : > { %p3100_p13 = pnand %p3099_p5, %p3093_p3 }
  0x61   : > { %3103 = shalt.err (!%p3100_p13)
}
  0x62   : > { %s3104_s30 = scalar_lea.vmem %s3488_s0, 1024  ;;  %s3303_s13 = smov [#allocation10]  }
  0x63   : > { %p3105_p0 = scmp.ne.s32.totalorder %s3488_s0, %s3104_s30  ;;  %s3109_s14 = sshll.u32 %s3303_s13, 4  ;;  %s3110_s14 = int_to_ptr.vmem [resolvable:$false] %s3109_s14 }
  0x64   : > { %s3111_s8 = scalar_lea.vmem %s3110_s14, 2048  ;;  %p3112_p2 = scmp.lt.s32.totalorder %s3488_s0, %s3110_s14 }
  0x65   : > { %p3107_p7 = pnand %p3105_p0, %p3091_p12  ;;  %p3113_p6 = scmp.lt.s32.totalorder %s3111_s8, %s3104_s30 }
  0x67   : > { %p3108_p4 = pneg %p3107_p7  ;;  %p3114_p10 = por %p3113_p6, %p3112_p2 }
  0x69   : > { %p3115_p8 = pnand %p3114_p10, %p3108_p4 }
  0x6b   : > { %3118 = shalt.err (!%p3115_p8)
}
  0x6c   : > { %s3304_s11 = smov 64   ;;  %s3305_s9 = smov 4  }
  0x6d   : > { %2903 = dma.hbm_to_vmem [thread:$0]  (!%p4293_p9), %s3482_s10, 1024, %s3488_s0, %s3454_s6, %s3304_s11, %s3304_s11, %s3305_s9  }
  0x6e   : > { %s4294_s15 = sadd.s32 1, %s3285_s23  ;;  %s3306_s16 = smov [#allocation7]  }
  0x6f   : > { %s3521_s21 = scalar_select %p3484_p11, %s3285_s23, %s4294_s15  }
  0x70   : > { %s211_s30 = sshll.u32 %s3306_s16, 4  ;;  %s3119_s8 = scalar_lea.hbm %s4246_s1, 2048  ;;  %s212_s30 = int_to_ptr.vmem [resolvable:$true] %s211_s30 }
  0x71   : > { %p3120_p12 = scmp.ne.s32.totalorder %s4246_s1, %s3119_s8  ;;  %p4295_p3 = scmp.ne.s32.totalorder %s4283_s7, 0 }
  0x72   : > { %p3126_p11 = scmp.lt.u32.totalorder %s3119_s8, %s4246_s1 }
  0x73   : > { %p4296_p1 = pneg %p4295_p3 }
  0x75   : > { %p3122_p5 = pnand %p3120_p12, %p4296_p1 }
  0x77   : > { %p3123_p13 = pneg %p3122_p5 }
  0x79   : > { %p3128_p9 = pnand %p3126_p11, %p3123_p13 }
  0x7b   : > { %3131 = shalt.err (!%p3128_p9)
}
  0x7c   : > { %s3132_s2 = scalar_lea.vmem %s212_s30, 2048  ;;  %p4297_p7 = pmov %p4296_p1 }
  0x7d   : > { %p3133_p0 = scmp.ne.s32.totalorder %s212_s30, %s3132_s2  ;;  %p3140_p6 = scmp.lt.s32.totalorder %s212_s30, %s212_s30 }
  0x7e   : > { %p3141_p10 = scmp.lt.s32.totalorder %s3132_s2, %s3132_s2 }
  0x7f   : > { %p3135_p4 = pnand %p3133_p0, %p4297_p7 }
  0x80   : > { %p3142_p8 = por %p3141_p10, %p3140_p6 }
  0x81   : > { %p3136_p2 = pneg %p3135_p4 }
  0x83   : > { %p3143_p1 = pnand %p3142_p8, %p3136_p2 }
  0x85   : > { %3146 = shalt.err (!%p3143_p1)
}
  0x86   : > { %2896 = dma.hbm_to_vmem [thread:$0]  (!%p4295_p3), %s4246_s1, 2048, %s212_s30, [#allocation8], %s3304_s11, %s3304_s11, %s3305_s9  }
  0x87   : > { %s138_s10 = ssub.s32 %s3293_s25, %s3475_s17  ;;  %s141_s7 = sadd.s32 1, %s3273_s20 }
  0x88   : > { %p139_p12 = scmp.eq.s32.totalorder %s138_s10, 0  ;;  %p148_p5 = scmp.ne.s32.totalorder %s3273_s20, %s3269_s19 }
  0x89   : > { %p154_p13 = scmp.ne.s32.totalorder %s3269_s19, %s3265_s18  ;;  %p4298_p11 = scmp.eq.s32.totalorder %s3297_s26, 0 }
  0x8a   : > { %s3551_s15 = scalar_select %p139_p12, %s3273_s20, %s141_s7  }
  0x8b   : > { %p150_p9 = por %p148_p5, %p4298_p11  ;;  %p4299_p0 = scmp.eq.s32.totalorder %s3384_s27, 0 }
  0x8c   : > { %s272_s13 = sand.u32 1, %s3273_s20   ;;  %s2271_s14 = sshll.u32 %s3293_s25, 7 }
  0x8d   : > { %p3557_p7 = por %p154_p13, %p4299_p0  ;;  %s2270_s8 = sshll.u32 %s272_s13, 3 }
  0x8e   : > { %s3566_s11 = scalar_lea.hbm %s4249_s4, %s2271_s14  ;;  %p4301_p3 = scmp.lt.s32.totalorder %s3297_s26, 4 }
  0x8f   : > { %s4300_s16 = scalar_select %p3557_p7, 1, 0 }
  0x90   : > { %p3570_p4 = pnand %p4301_p3, %p150_p9  ;;  %s274_s9 = scalar_lea.vmem [#allocation11], %s2270_s8 }
  0x91   : > { %s281_s30 = sshll.u32 %s274_s9, 4  ;;  %s3147_s2 = scalar_lea.hbm %s3566_s11, 128  ;;  %s282_s30 = int_to_ptr.vmem [resolvable:$true] %s281_s30 }
  0x92   : > { %p3148_p2 = scmp.ne.s32.totalorder %s3566_s11, %s3147_s2  ;;  %p3149_p6 = pneg %p3570_p4 }
  0x93   : > { %s3152_s10 = scalar_lea.hbm %s4249_s4, 512  ;;  %p3153_p1 = scmp.lt.u32.totalorder %s3566_s11, %s4249_s4 }
  0x94   : > { %p3150_p10 = pnand %p3149_p6, %p3148_p2  ;;  %p3154_p12 = scmp.lt.u32.totalorder %s3152_s10, %s3147_s2 }
  0x95   : > { %p3156_p13 = scmp.lt.u32.totalorder %s3147_s2, %s3566_s11 }
  0x96   : > { %p3151_p8 = pneg %p3150_p10  ;;  %p3155_p5 = por %p3154_p12, %p3153_p1 }
  0x98   : > { %p3157_p11 = por %p3156_p13, %p3155_p5 }
  0x9a   : > { %p3158_p9 = pnand %p3157_p11, %p3151_p8 }
  0x9c   : > { %3161 = shalt.err (!%p3158_p9)
}
  0x9d   : > { %s3162_s14 = scalar_lea.vmem %s282_s30, 128  ;;  %s3307_s8 = smov [#allocation11]  }
  0x9e   : > { %p3163_p0 = scmp.ne.s32.totalorder %s282_s30, %s3162_s14  ;;  %s3167_s0 = sshll.u32 %s3307_s8, 4  ;;  %s3168_s0 = int_to_ptr.vmem [resolvable:$false] %s3167_s0 }
  0x9f   : > { %s3169_s12 = scalar_lea.vmem %s3168_s0, 256  ;;  %p3170_p10 = scmp.lt.s32.totalorder %s282_s30, %s3168_s0 }
  0xa0   : > { %p3165_p3 = pnand %p3163_p0, %p3149_p6  ;;  %p3171_p7 = scmp.lt.s32.totalorder %s3169_s12, %s3162_s14 }
  0xa2   : > { %p3166_p2 = pneg %p3165_p3  ;;  %p3172_p1 = por %p3171_p7, %p3170_p10 }
  0xa4   : > { %p3173_p12 = pnand %p3172_p1, %p3166_p2 }
  0xa6   : > { %3176 = shalt.err (!%p3173_p12)
}
  0xa7   : > { %2906 = dma.hbm_to_vmem [thread:$0]  (!%p3570_p4), %s3566_s11, 128, %s282_s30, %s3454_s6  }
  0xa8   : > { %p4303_p8 = scmp.ne.s32.totalorder %s4282_s29, 0 }
  0xaa   : > { %290 = sbr.rel (%p4303_p8) target bundleno = 1927 (0x787), region = 40 }
  0xb1   : > { %p4304_p6 = scmp.eq.s32.totalorder %s3384_s27, 0 }
  0xb3   : > { %3240 = dma.done.wait (%p4304_p6), [#allocation5], 4096   ;;  %p4305_p5 = pmov %p4304_p6 }
  0xb5   : > { %3242 = vsyncadd (%p4305_p5), [#allocation5], 4294963200  ;;  %p4306_p13 = pmov %p4305_p5 }
  0xb6   : > { %p4307_p7 = pmov %p4305_p5 }
  0xb7   : > { %3244 = dma.done.wait (%p4306_p13), [#allocation8], 2048  }
  0xb8   : > { %3246 = vsyncadd (%p4307_p7), [#allocation8], 4294965248  ;;  %s300_s18 = sand.u32 1, %s3384_s27   ;;  %p4308_p4 = pmov %p4305_p5 }
  0xb9   : > { %s301_s9 = scalar_lea.sflag [#allocation5], %s300_s18 }
  0xba   : > { %3248 = dma.done.wait (%p4308_p4), %s301_s9, 128   ;;  %p4309_p11 = pmov %p4308_p4 }
  0xbb   : > { %s311_s29 = sand.u32 1, %s3281_s22   ;;  %p4310_p9 = scmp.ne.s32.totalorder %s4281_s28, 0 }
  0xbc   : > { %3250 = vsyncadd (%p4309_p11), %s301_s9, 4294967168  ;;  %s2276_s6 = sshll.u32 %s311_s29, 6 }
  0xbd   : > { %s3612_s11 = scalar_lea.vmem [#allocation10], %s2276_s6 }
  0xbe   : > { %3252 = dma.done.wait (%p4310_p9), %s301_s9, 1024  }
  0xbf   : > { %3254 = vsyncadd (%p4310_p9), %s301_s9, 4294966272  ;;  %s320_s30 = sand.u32 1, %s3269_s19   ;;  %p4311_p0 = scmp.ne.s32.totalorder %s4300_s16, 0 }
  0xc0   : > { %s3619_s2 = sshll.u32 %s320_s30, 3 }
  0xc1   : > { %s322_s3 = scalar_lea.vmem [#allocation11], %s3619_s2 }
  0xc2   : > { %3256 = dma.done.wait (%p4311_p0), %s301_s9, 128  }
  0xc3   : > { %3258 = vsyncadd (%p4311_p0), %s301_s9, 4294967168  ;;  %p361_p3 = scmp.eq.s32.totalorder %s3289_s24, 3  ;;  %p362_p2 = scmp.eq.s32.totalorder %s3289_s24, 0 }
  0xc4   : > { %v2997_v0 = vld [vmem:[#allocation7] sm:$0xff] (%p362_p2)   ;;  %v2998_v1 = vld [vmem:[#allocation7 + $0x8] sm:$0xff] (%p362_p2)   ;;  %v2999_v2 = vld [vmem:[#allocation7 + $0x10] sm:$0xff] (%p362_p2)  }
  0xc5   : > { %367 = sbr.rel (!%p362_p2) target bundleno = 205 (0xcd), region = 64  ;;  %496 = vst [vmem:[#allocation2] sm:$0xff] (%p362_p2), %v2997_v0  ;;  %497 = vst [vmem:[#allocation2 + $0x8] sm:$0xff] (%p362_p2), %v2998_v1  ;;  %v3000_v3 = vld [vmem:[#allocation7 + $0x18] sm:$0xff] (%p362_p2)   ;;  %v3001_v4 = vld [vmem:[#allocation7 + $0x20] sm:$0xff] (%p362_p2)  }
  0xc6   : > { %498 = vst [vmem:[#allocation2 + $0x10] sm:$0xff] (%p362_p2), %v2999_v2  ;;  %499 = vst [vmem:[#allocation2 + $0x18] sm:$0xff] (%p362_p2), %v3000_v3  ;;  %v3002_v5 = vld [vmem:[#allocation7 + $0x28] sm:$0xff] (%p362_p2)   ;;  %v3003_v6 = vld [vmem:[#allocation7 + $0x30] sm:$0xff] (%p362_p2)  }
  0xc7   : > { %500 = vst [vmem:[#allocation2 + $0x20] sm:$0xff] (%p362_p2), %v3001_v4  ;;  %501 = vst [vmem:[#allocation2 + $0x28] sm:$0xff] (%p362_p2), %v3002_v5  ;;  %v3004_v7 = vld [vmem:[#allocation7 + $0x38] sm:$0xff] (%p362_p2)   ;;  %v3005_v8 = vld [vmem:[#allocation7 + $0x40] sm:$0xff] (%p362_p2)  }
  0xc8   : > { %502 = vst [vmem:[#allocation2 + $0x30] sm:$0xff] (%p362_p2), %v3003_v6  ;;  %503 = vst [vmem:[#allocation2 + $0x38] sm:$0xff] (%p362_p2), %v3004_v7  ;;  %v3006_v9 = vld [vmem:[#allocation7 + $0x48] sm:$0xff] (%p362_p2)   ;;  %v3007_v10 = vld [vmem:[#allocation7 + $0x50] sm:$0xff] (%p362_p2)  }
  0xc9   : > { %504 = vst [vmem:[#allocation2 + $0x40] sm:$0xff] (%p362_p2), %v3005_v8  ;;  %505 = vst [vmem:[#allocation2 + $0x48] sm:$0xff] (%p362_p2), %v3006_v9  ;;  %v3008_v11 = vld [vmem:[#allocation7 + $0x58] sm:$0xff] (%p362_p2)   ;;  %v3009_v12 = vld [vmem:[#allocation7 + $0x60] sm:$0xff] (%p362_p2)  }
  0xca   : > { %506 = vst [vmem:[#allocation2 + $0x50] sm:$0xff] (%p362_p2), %v3007_v10  ;;  %507 = vst [vmem:[#allocation2 + $0x58] sm:$0xff] (%p362_p2), %v3008_v11  ;;  %v3010_v13 = vld [vmem:[#allocation7 + $0x68] sm:$0xff] (%p362_p2)   ;;  %v3011_v14 = vld [vmem:[#allocation7 + $0x70] sm:$0xff] (%p362_p2)  }
  0xcb   : > { %508 = vst [vmem:[#allocation2 + $0x60] sm:$0xff] (%p362_p2), %v3009_v12  ;;  %509 = vst [vmem:[#allocation2 + $0x68] sm:$0xff] (%p362_p2), %v3010_v13  ;;  %v3012_v15 = vld [vmem:[#allocation7 + $0x78] sm:$0xff] (%p362_p2)  }
  0xcc   : > { %510 = vst [vmem:[#allocation2 + $0x70] sm:$0xff] %v3011_v14  ;;  %511 = vst [vmem:[#allocation2 + $0x78] sm:$0xff] %v3012_v15 }
  0xcd PF: > { %515 = sbr.rel (!%p361_p3) target bundleno = 212 (0xd4), region = 68  ;;  %v3308_v16 = vmov (%p361_p3), 0.0  }
  0xce   : > { %516 = vst [vmem:[#allocation12] sm:$0xff] (%p361_p3), %v3308_v16 }
  0xd4 PF: > { %v3630_v17 = vld [vmem:[#allocation4] sm:$0xff]  ;;  %v3632_v18 = vld [vmem:[#allocation4 + $0x8] sm:$0xff]  ;;  %v3634_v19 = vld [vmem:[#allocation4 + $0x10] sm:$0xff]  ;;  %p556_p10 = scmp.lt.s32.totalorder %s3289_s24, 0  ;;  %s557_s28 = ssub.s32 0, %s3289_s24 }
  0xd5   : > { %v3638_v20 = vld [vmem:[#allocation4 + $0x18] sm:$0xff]  ;;  %v3640_v21 = vld [vmem:[#allocation4 + $0x20] sm:$0xff]  ;;  %v3642_v22 = vld [vmem:[#allocation4 + $0x28] sm:$0xff]  ;;  %s2296_s16 = smin.u32 %s3289_s24, %s557_s28 }
  0xd6   : > { %v3645_v23 = vld [vmem:[#allocation4 + $0x30] sm:$0xff]  ;;  %v3647_v24 = vld [vmem:[#allocation4 + $0x38] sm:$0xff]  ;;  %v3649_v25 = vld [vmem:[#allocation4 + $0x40] sm:$0xff]  ;;  %s559_s5 = sand.u32 1, %s2296_s16  }
  0xd7   : > { %v3651_v26 = vld [vmem:[#allocation4 + $0x48] sm:$0xff]  ;;  %v3653_v27 = vld [vmem:[#allocation4 + $0x50] sm:$0xff]  ;;  %v3655_v28 = vld [vmem:[#allocation4 + $0x58] sm:$0xff]  ;;  %s560_s10 = ssub.s32 0, %s559_s5 }
  0xd8   : > { %v3657_v29 = vld [vmem:[#allocation4 + $0x60] sm:$0xff]  ;;  %v3659_v30 = vld [vmem:[#allocation4 + $0x68] sm:$0xff]  ;;  %v3661_v31 = vld [vmem:[#allocation4 + $0x70] sm:$0xff]  ;;  %s4343_s10 = smov (!%p556_p10, %s560_s10), %s559_s5 }
  0xd9   : > { %4312 = vst [vmem:[#allocation19_spill] sm:$0xff] %v3657_v29  ;;  %4313 = vst [vmem:[#allocation20_spill] sm:$0xff] %v3661_v31  ;;  %v3667_v32 = vld [vmem:[#allocation4 + $0x78] sm:$0xff]  ;;  %v3669_v33 = vld [vmem:[#allocation4 + $0x80] sm:$0xff]  ;;  %p2297_p1 = scmp.ne.s32.totalorder %s4343_s10, 0 }
  0xda   : > { %4314 = vst [vmem:[#allocation21_spill] sm:$0xff] %v3667_v32  ;;  %v3671_v34 = vld [vmem:[#allocation4 + $0x88] sm:$0xff]  ;;  %v3673_v35 = vld [vmem:[#allocation4 + $0x90] sm:$0xff]  ;;  %v3675_v36 = vld [vmem:[#allocation4 + $0x98] sm:$0xff]  ;;  %v2299_v53 = vcombine.high (!%p2297_p1), %v3630_v17, %v3632_v18  ;;  %v2298_v4 = vcombine.low (!%p2297_p1), %v3630_v17, %v3632_v18  ;;  %v2301_v6 = vcombine.high (!%p2297_p1), %v3634_v19, %v3638_v20  ;;  %v2300_v8 = vcombine.low (!%p2297_p1), %v3634_v19, %v3638_v20 }
  0xdb   : > { %v3677_v37 = vld [vmem:[#allocation4 + $0xa0] sm:$0xff]  ;;  %v3679_v38 = vld [vmem:[#allocation4 + $0xa8] sm:$0xff]  ;;  %v3681_v39 = vld [vmem:[#allocation4 + $0xb0] sm:$0xff]  ;;  %565 = sbr.rel (%p2297_p1) target bundleno = 1059 (0x423), region = 72  ;;  %v2315_v54 = vcombine.high (!%p2297_p1), %v3669_v33, %v3671_v34  ;;  %v2314_v5 = vcombine.low (!%p2297_p1), %v3669_v33, %v3671_v34  ;;  %v2317_v7 = vcombine.high (!%p2297_p1), %v3673_v35, %v3675_v36  ;;  %v2316_v9 = vcombine.low (!%p2297_p1), %v3673_v35, %v3675_v36 }
  0xdc   : > { %v3683_v40 = vld [vmem:[#allocation4 + $0xb8] sm:$0xff]  ;;  %v3685_v41 = vld [vmem:[#allocation4 + $0xc0] sm:$0xff]  ;;  %v3687_v42 = vld [vmem:[#allocation4 + $0xc8] sm:$0xff]  ;;  %778 = vmatprep.mubr.bf16.mxu0 (!%p2297_p1), %v2299_v53  ;;  %v2303_v10 = vcombine.high (!%p2297_p1), %v3640_v21, %v3642_v22  ;;  %v2319_v11 = vcombine.high (!%p2297_p1), %v3677_v37, %v3679_v38  ;;  %v2302_v12 = vcombine.low (!%p2297_p1), %v3640_v21, %v3642_v22  ;;  %v2318_v13 = vcombine.low (!%p2297_p1), %v3677_v37, %v3679_v38 }
  0xdd   : > { %v3689_v43 = vld [vmem:[#allocation4 + $0xd0] sm:$0xff]  ;;  %v3691_v44 = vld [vmem:[#allocation4 + $0xd8] sm:$0xff]  ;;  %v3693_v45 = vld [vmem:[#allocation4 + $0xe0] sm:$0xff]  ;;  %842 = vmatprep.mubr.bf16.mxu1 (!%p2297_p1), %v2315_v54  ;;  %v2305_v14 = vcombine.high (!%p2297_p1), %v3645_v23, %v3647_v24  ;;  %v2321_v15 = vcombine.high (!%p2297_p1), %v3681_v39, %v3683_v40  ;;  %v2304_v16 = vcombine.low (!%p2297_p1), %v3645_v23, %v3647_v24  ;;  %v2306_v53 = vcombine.low (!%p2297_p1), %v3649_v25, %v3651_v26 }
  0xde   : > { %4315 = vst [vmem:[#allocation22_spill] sm:$0xff] %v3693_v45  ;;  %v3695_v46 = vld [vmem:[#allocation4 + $0xe8] sm:$0xff]  ;;  %v3697_v47 = vld [vmem:[#allocation4 + $0xf0] sm:$0xff]  ;;  %v3699_v48 = vld [vmem:[#allocation4 + $0xf8] sm:$0xff]  ;;  %v2322_v54 = vcombine.low (!%p2297_p1), %v3685_v41, %v3687_v42 }
  0xdf   : > { %4316 = vst [vmem:[#allocation23_spill] sm:$0xff] %v3695_v46  ;;  %4317 = vst [vmem:[#allocation24_spill] sm:$0xff] %v3697_v47  ;;  %v3703_v49 = vld [vmem:[%s322_s3] sm:$0xff]  ;;  %v574_v50 = vld [vmem:[#allocation2 + $0x40] sm:$0xff] (!%p2297_p1) }
  0xe0   : > { %4318 = vst [vmem:[#allocation25_spill] sm:$0xff] %v3699_v48  ;;  %4319 = vst [vmem:[#allocation26_spill] sm:$0xff] %v3703_v49  ;;  %v566_v51 = vld [vmem:[#allocation2] sm:$0xff] (!%p2297_p1)  ;;  %v575_v52 = vld [vmem:[#allocation2 + $0x48] sm:$0xff] (!%p2297_p1)  ;;  %2394 = vmatprep.subr.bf16.mxu0 (!%p2297_p1), %v574_v50  ;;  %2806 = vmatprep.subr.bf16.mxu1 (!%p2297_p1), %v574_v50  ;;  %v2320_v50 = vcombine.low (!%p2297_p1), %v3681_v39, %v3683_v40 }
  0xe1   : > { %2395 = vmatpush3.bf16.msra.mxu0 (!%p2297_p1), %v566_v51  ;;  %2814 = vmatpush3.bf16.msra.mxu1 (!%p2297_p1), %v566_v51  ;;  %v567_v55 = vld [vmem:[#allocation2 + $0x8] sm:$0xff] (!%p2297_p1)  ;;  %v576_v56 = vld [vmem:[#allocation2 + $0x50] sm:$0xff] (!%p2297_p1)  ;;  %v577_v58 = vld [vmem:[#allocation2 + $0x58] sm:$0xff] (!%p2297_p1)  ;;  %v2307_v51 = vcombine.high (!%p2297_p1), %v3649_v25, %v3651_v26 }
  0xe2   : > { %2396 = vmatprep.subr.bf16.mxu0 %v575_v52  ;;  %2807 = vmatprep.subr.bf16.mxu1 %v575_v52  ;;  %v568_v57 = vld [vmem:[#allocation2 + $0x10] sm:$0xff]  ;;  %v569_v59 = vld [vmem:[#allocation2 + $0x18] sm:$0xff]  ;;  %v578_v60 = vld [vmem:[#allocation2 + $0x60] sm:$0xff]  ;;  %v2323_v52 = vcombine.high %v3685_v41, %v3687_v42 }
  0xe3   : > { %v570_v61 = vld [vmem:[#allocation2 + $0x20] sm:$0xff]  ;;  %v579_v62 = vld [vmem:[#allocation2 + $0x68] sm:$0xff]  ;;  %v580_v0 = vld [vmem:[#allocation2 + $0x70] sm:$0xff] }
  0xe4   : > { %v571_v63 = vld [vmem:[#allocation2 + $0x28] sm:$0xff]  ;;  %v572_v1 = vld [vmem:[#allocation2 + $0x30] sm:$0xff]  ;;  %v581_v2 = vld [vmem:[#allocation2 + $0x78] sm:$0xff] }
  0xe5   : > { %2397 = vmatpush3.bf16.msra.mxu0 %v567_v55  ;;  %2815 = vmatpush3.bf16.msra.mxu1 %v567_v55  ;;  %v573_v3 = vld [vmem:[#allocation2 + $0x38] sm:$0xff]  ;;  %v2309_v55 = vcombine.high %v3653_v27, %v3655_v28 }
  0xe6   : > { %2398 = vmatprep.subr.bf16.mxu0 %v576_v56  ;;  %2808 = vmatprep.subr.bf16.mxu1 %v576_v56  ;;  %v2325_v56 = vcombine.high %v3689_v43, %v3691_v44 }
  0xe9   : > { %2399 = vmatpush3.bf16.msra.mxu0 %v568_v57  ;;  %2816 = vmatpush3.bf16.msra.mxu1 %v568_v57  ;;  %v2308_v57 = vcombine.low %v3653_v27, %v3655_v28 }
  0xea   : > { %2400 = vmatprep.subr.bf16.mxu0 %v577_v58  ;;  %2809 = vmatprep.subr.bf16.mxu1 %v577_v58  ;;  %v2324_v58 = vcombine.low %v3689_v43, %v3691_v44 }
  0xed   : > { %2401 = vmatpush3.bf16.msra.mxu0 %v569_v59  ;;  %2817 = vmatpush3.bf16.msra.mxu1 %v569_v59  ;;  %v2311_v59 = vcombine.high %v3657_v29, %v3659_v30 }
  0xee   : > { %2402 = vmatprep.subr.bf16.mxu0 %v578_v60  ;;  %2810 = vmatprep.subr.bf16.mxu1 %v578_v60  ;;  %v2327_v60 = vcombine.high %v3693_v45, %v3695_v46 }
  0xf1   : > { %2403 = vmatpush3.bf16.msra.mxu0 %v570_v61  ;;  %2818 = vmatpush3.bf16.msra.mxu1 %v570_v61  ;;  %v2310_v61 = vcombine.low %v3657_v29, %v3659_v30 }
  0xf2   : > { %2404 = vmatprep.subr.bf16.mxu0 %v579_v62  ;;  %2811 = vmatprep.subr.bf16.mxu1 %v579_v62  ;;  %v2326_v62 = vcombine.low %v3693_v45, %v3695_v46 }
  0xf5   : > { %2405 = vmatpush3.bf16.msra.mxu0 %v571_v63  ;;  %2819 = vmatpush3.bf16.msra.mxu1 %v571_v63  ;;  %v2313_v63 = vcombine.high %v3661_v31, %v3667_v32 }
  0xf6   : > { %2406 = vmatprep.subr.bf16.mxu0 %v580_v0  ;;  %2812 = vmatprep.subr.bf16.mxu1 %v580_v0  ;;  %v2329_v0 = vcombine.high %v3697_v47, %v3699_v48 }
  0xf9   : > { %2407 = vmatpush3.bf16.msra.mxu0 %v572_v1  ;;  %2820 = vmatpush3.bf16.msra.mxu1 %v572_v1  ;;  %v2312_v1 = vcombine.low %v3661_v31, %v3667_v32 }
  0xfa   : > { %2408 = vmatprep.subr.bf16.mxu0 %v581_v2  ;;  %2813 = vmatprep.subr.bf16.mxu1 %v581_v2  ;;  %v2328_v2 = vcombine.low %v3697_v47, %v3699_v48 }
  0xfd   : > { %2409 = vmatpush3.bf16.msra.mxu0 %v573_v3  ;;  %2821 = vmatpush3.bf16.msra.mxu1 %v573_v3  ;;  %v582_v3 = vlaneseq }
 0x100   : > { %779 = vmatmul.mubr.bf16.vlgmr.msra.gmra.mrb[0].mxu0 %v2298_v4  ;;  %843 = vmatmul.mubr.bf16.vlgmr.msra.gmra.mrb[0].mxu1 %v2314_v5  ;;  %v583_v4 = vshrl.u32 %v582_v3, 7 }
 0x101   : > { %786 = vmatprep.mubr.bf16.mxu0 %v2301_v6  ;;  %850 = vmatprep.mubr.bf16.mxu1 %v2317_v7 }
 0x102   : > { %v584_v5 = vsub.s32 0, %v583_v4  ;;  %v941_v6 = vsub.s32 1, %v583_v4 }
 0x108   : > { %787 = vmatmul.mubr.bf16.gmra.mrb[4].mxu0 %v2300_v8  ;;  %851 = vmatmul.mubr.bf16.gmra.mrb[4].mxu1 %v2316_v9  ;;  %v3771_v9 = vrot.slane %v3703_v49, %v584_v5 }
 0x109   : > { %794 = vmatprep.mubr.bf16.mxu0 %v2303_v10  ;;  %858 = vmatprep.mubr.bf16.mxu1 %v2319_v11 }
 0x110   : > { %795 = vmatmul.mubr.bf16.gmra.mrb[8].mxu0 %v2302_v12  ;;  %859 = vmatmul.mubr.bf16.gmra.mrb[8].mxu1 %v2318_v13 }
 0x111   : > { %802 = vmatprep.mubr.bf16.mxu0 %v2305_v14  ;;  %866 = vmatprep.mubr.bf16.mxu1 %v2321_v15 }
 0x118   : > { %803 = vmatmul.mubr.bf16.gmra.mrb[12].mxu0 %v2304_v16  ;;  %867 = vmatmul.mubr.bf16.gmra.mrb[12].mxu1 %v2320_v50  ;;  %v3774_v16 = vrot.slane %v3703_v49, %v941_v6  ;;  %v977_v50 = vsub.s32 2, %v583_v4 }
 0x119   : > { %810 = vmatprep.mubr.bf16.mxu0 %v2307_v51  ;;  %874 = vmatprep.mubr.bf16.mxu1 %v2323_v52 }
 0x120   : > { %811 = vmatmul.mubr.bf16.gmra.mrb[16].mxu0 %v2306_v53  ;;  %875 = vmatmul.mubr.bf16.gmra.mrb[16].mxu1 %v2322_v54 }
 0x121   : > { %818 = vmatprep.mubr.bf16.mxu0 %v2309_v55  ;;  %882 = vmatprep.mubr.bf16.mxu1 %v2325_v56 }
 0x128   : > { %819 = vmatmul.mubr.bf16.gmra.mrb[20].mxu0 %v2308_v57  ;;  %883 = vmatmul.mubr.bf16.gmra.mrb[20].mxu1 %v2324_v58 }
 0x129   : > { %826 = vmatprep.mubr.bf16.mxu0 %v2311_v59  ;;  %890 = vmatprep.mubr.bf16.mxu1 %v2327_v60 }
 0x130   : > { %827 = vmatmul.mubr.bf16.gmra.mrb[24].mxu0 %v2310_v61  ;;  %891 = vmatmul.mubr.bf16.gmra.mrb[24].mxu1 %v2326_v62  ;;  %v3781_v61 = vrot.slane %v3703_v49, %v977_v50 }
 0x131   : > { %834 = vmatprep.mubr.bf16.mxu0 %v2313_v63  ;;  %898 = vmatprep.mubr.bf16.mxu1 %v2329_v0 }
 0x138   : > { %835 = vmatmul.mubr.bf16.gmra.mrb[28].mxu0 %v2312_v1  ;;  %899 = vmatmul.mubr.bf16.gmra.mrb[28].mxu1 %v2328_v2 }
 0x1d3   : > { %v2410_v7 = vpop.f32.mrb[0].mxu0  ;;  %v2458_v8 = vpop.f32.mrb[0].mxu1 }
 0x1d4   : > { %v2411_v10 = vpop.f32.mrb[1].mxu0  ;;  %v2459_v11 = vpop.f32.mrb[1].mxu1 }
 0x1d5   : > { %v2412_v12 = vadd.f32 %v2411_v10, %v2410_v7  ;;  %v2460_v13 = vadd.f32 %v2459_v11, %v2458_v8  ;;  %v2413_v14 = vpop.f32.mrb[2].mxu0  ;;  %v2461_v15 = vpop.f32.mrb[2].mxu1 }
 0x1d6   : > { %v2414_v51 = vpop.f32.mrb[3].mxu0  ;;  %v2462_v52 = vpop.f32.mrb[3].mxu1 }
 0x1d7   : > { %v781_v53 = vadd.f32 %v2412_v12, %v3771_v9  ;;  %v845_v54 = vadd.f32 %v2460_v13, %v3771_v9  ;;  %v2415_v55 = vadd.f32 %v2414_v51, %v2413_v14  ;;  %v2463_v56 = vadd.f32 %v2462_v52, %v2461_v15 }
 0x1d9   : > { %v907_v57 = vmax.f32 %v781_v53, 0.0  ;;  %v923_v58 = vmax.f32 %v845_v54, 0.0  ;;  %v784_v59 = vadd.f32 %v2415_v55, %v3771_v9  ;;  %v848_v60 = vadd.f32 %v2463_v56, %v3771_v9 }
 0x1db   : > { %v943_v62 = vmul.f32 %v3774_v16, %v907_v57  ;;  %v959_v63 = vmul.f32 %v3774_v16, %v923_v58  ;;  %v908_v0 = vmax.f32 %v784_v59, 0.0  ;;  %v924_v1 = vmax.f32 %v848_v60, 0.0  ;;  %v2416_v2 = vpop.f32.mrb[4].mxu0  ;;  %v2464_v3 = vpop.f32.mrb[4].mxu1 }
 0x1dc   : > { %v2417_v4 = vpop.f32.mrb[5].mxu0  ;;  %v2465_v5 = vpop.f32.mrb[5].mxu1 }
 0x1dd   : > { %v944_v6 = vmul.f32 %v3774_v16, %v908_v0  ;;  %v960_v7 = vmul.f32 %v3774_v16, %v924_v1  ;;  %v2419_v8 = vpop.f32.mrb[6].mxu0  ;;  %v2467_v10 = vpop.f32.mrb[6].mxu1  ;;  %v979_v11 = vadd.f32 %v3781_v61, %v943_v62  ;;  %v995_v12 = vadd.f32 %v3781_v61, %v959_v63 }
 0x1de   : > { %v2418_v13 = vadd.f32 %v2417_v4, %v2416_v2  ;;  %v2466_v14 = vadd.f32 %v2465_v5, %v2464_v3  ;;  %v2420_v15 = vpop.f32.mrb[7].mxu0  ;;  %v2468_v50 = vpop.f32.mrb[7].mxu1 }
 0x1df   : > { %v980_v51 = vadd.f32 %v3781_v61, %v944_v6  ;;  %v996_v52 = vadd.f32 %v3781_v61, %v960_v7  ;;  %v2421_v53 = vadd.f32 %v2420_v15, %v2419_v8  ;;  %v2469_v54 = vadd.f32 %v2468_v50, %v2467_v10 }
 0x1e0   : > { %v789_v55 = vadd.f32 %v2418_v13, %v3771_v9  ;;  %v853_v56 = vadd.f32 %v2466_v14, %v3771_v9 }
 0x1e1   : > { %v3793_v57 = vpack.c.bf16 %v980_v51, %v979_v11  ;;  %v3795_v58 = vpack.c.bf16 %v996_v52, %v995_v12  ;;  %v792_v59 = vadd.f32 %v2421_v53, %v3771_v9  ;;  %v856_v60 = vadd.f32 %v2469_v54, %v3771_v9 }
 0x1e2   : > { %v909_v62 = vmax.f32 %v789_v55, 0.0  ;;  %v925_v63 = vmax.f32 %v853_v56, 0.0 }
 0x1e3   : > { %v910_v0 = vmax.f32 %v792_v59, 0.0  ;;  %v926_v1 = vmax.f32 %v856_v60, 0.0  ;;  %v2422_v2 = vpop.f32.mrb[8].mxu0  ;;  %v2470_v3 = vpop.f32.mrb[8].mxu1  ;;  %2726 = vmatprep.mubr.bf16.mxu0 (!%p361_p3), %v3793_v57  ;;  %2742 = vmatprep.mubr.bf16.mxu1 (!%p361_p3), %v3795_v58 }
 0x1e4   : > { %v945_v4 = vmul.f32 %v3774_v16, %v909_v62  ;;  %v961_v5 = vmul.f32 %v3774_v16, %v925_v63  ;;  %v2423_v6 = vpop.f32.mrb[9].mxu0  ;;  %v2471_v7 = vpop.f32.mrb[9].mxu1 }
 0x1e5   : > { %v946_v8 = vmul.f32 %v3774_v16, %v910_v0  ;;  %v962_v10 = vmul.f32 %v3774_v16, %v926_v1  ;;  %v2424_v11 = vadd.f32 %v2423_v6, %v2422_v2  ;;  %v2472_v12 = vadd.f32 %v2471_v7, %v2470_v3  ;;  %v2425_v13 = vpop.f32.mrb[10].mxu0  ;;  %v2473_v14 = vpop.f32.mrb[10].mxu1 }
 0x1e6   : > { %v981_v15 = vadd.f32 %v3781_v61, %v945_v4  ;;  %v997_v50 = vadd.f32 %v3781_v61, %v961_v5  ;;  %v2426_v51 = vpop.f32.mrb[11].mxu0  ;;  %v2474_v52 = vpop.f32.mrb[11].mxu1 }
 0x1e7   : > { %v982_v53 = vadd.f32 %v3781_v61, %v946_v8  ;;  %v998_v54 = vadd.f32 %v3781_v61, %v962_v10  ;;  %v797_v55 = vadd.f32 %v2424_v11, %v3771_v9  ;;  %v861_v56 = vadd.f32 %v2472_v12, %v3771_v9 }
 0x1e8   : > { %v2427_v59 = vadd.f32 %v2426_v51, %v2425_v13  ;;  %v2475_v60 = vadd.f32 %v2474_v52, %v2473_v14 }
 0x1e9   : > { %v3809_v62 = vpack.c.bf16 %v982_v53, %v981_v15  ;;  %v3811_v63 = vpack.c.bf16 %v998_v54, %v997_v50  ;;  %v911_v0 = vmax.f32 %v797_v55, 0.0  ;;  %v927_v1 = vmax.f32 %v861_v56, 0.0 }
 0x1ea   : > { %v800_v2 = vadd.f32 %v2427_v59, %v3771_v9  ;;  %v864_v3 = vadd.f32 %v2475_v60, %v3771_v9 }
 0x1eb   : > { %v2428_v4 = vpop.f32.mrb[12].mxu0  ;;  %v2476_v5 = vpop.f32.mrb[12].mxu1  ;;  %v947_v6 = vmul.f32 %v3774_v16, %v911_v0  ;;  %v963_v7 = vmul.f32 %v3774_v16, %v927_v1 }
 0x1ec   : > { %v912_v8 = vmax.f32 %v800_v2, 0.0  ;;  %v928_v10 = vmax.f32 %v864_v3, 0.0  ;;  %v2429_v11 = vpop.f32.mrb[13].mxu0  ;;  %v2477_v12 = vpop.f32.mrb[13].mxu1 }
 0x1ed   : > { %v2430_v13 = vadd.f32 %v2429_v11, %v2428_v4  ;;  %v2478_v14 = vadd.f32 %v2477_v12, %v2476_v5  ;;  %v2431_v15 = vpop.f32.mrb[14].mxu0  ;;  %v2479_v50 = vpop.f32.mrb[14].mxu1  ;;  %v983_v0 = vadd.f32 %v3781_v61, %v947_v6  ;;  %v999_v1 = vadd.f32 %v3781_v61, %v963_v7 }
 0x1ee   : > { %v948_v51 = vmul.f32 %v3774_v16, %v912_v8  ;;  %v964_v52 = vmul.f32 %v3774_v16, %v928_v10  ;;  %v2432_v53 = vpop.f32.mrb[15].mxu0  ;;  %v2480_v54 = vpop.f32.mrb[15].mxu1 }
 0x1ef   : > { %v805_v55 = vadd.f32 %v2430_v13, %v3771_v9  ;;  %v869_v56 = vadd.f32 %v2478_v14, %v3771_v9  ;;  %v2433_v59 = vadd.f32 %v2432_v53, %v2431_v15  ;;  %v2481_v60 = vadd.f32 %v2480_v54, %v2479_v50 }
 0x1f0   : > { %v984_v2 = vadd.f32 %v3781_v61, %v948_v51  ;;  %v1000_v3 = vadd.f32 %v3781_v61, %v964_v52 }
 0x1f1   : > { %v913_v4 = vmax.f32 %v805_v55, 0.0  ;;  %v929_v5 = vmax.f32 %v869_v56, 0.0  ;;  %v808_v8 = vadd.f32 %v2433_v59, %v3771_v9  ;;  %v872_v10 = vadd.f32 %v2481_v60, %v3771_v9 }
 0x1f2   : > { %v3827_v11 = vpack.c.bf16 %v984_v2, %v983_v0  ;;  %v3829_v12 = vpack.c.bf16 %v1000_v3, %v999_v1 }
 0x1f3   : > { %v949_v13 = vmul.f32 %v3774_v16, %v913_v4  ;;  %v965_v6 = vmul.f32 %v3774_v16, %v929_v5  ;;  %v914_v14 = vmax.f32 %v808_v8, 0.0  ;;  %v930_v7 = vmax.f32 %v872_v10, 0.0  ;;  %v2434_v15 = vpop.f32.mrb[16].mxu0  ;;  %v2482_v50 = vpop.f32.mrb[16].mxu1 }
 0x1f4   : > { %v2435_v51 = vpop.f32.mrb[17].mxu0  ;;  %v2483_v52 = vpop.f32.mrb[17].mxu1 }
 0x1f5   : > { %v950_v53 = vmul.f32 %v3774_v16, %v914_v14  ;;  %v966_v54 = vmul.f32 %v3774_v16, %v930_v7  ;;  %v2437_v55 = vpop.f32.mrb[18].mxu0  ;;  %v2485_v56 = vpop.f32.mrb[18].mxu1  ;;  %v985_v59 = vadd.f32 %v3781_v61, %v949_v13  ;;  %v1001_v60 = vadd.f32 %v3781_v61, %v965_v6 }
 0x1f6   : > { %v2436_v0 = vadd.f32 %v2435_v51, %v2434_v15  ;;  %v2484_v1 = vadd.f32 %v2483_v52, %v2482_v50  ;;  %v2438_v2 = vpop.f32.mrb[19].mxu0  ;;  %v2486_v3 = vpop.f32.mrb[19].mxu1 }
 0x1f7   : > { %v986_v4 = vadd.f32 %v3781_v61, %v950_v53  ;;  %v1002_v5 = vadd.f32 %v3781_v61, %v966_v54  ;;  %v2439_v8 = vadd.f32 %v2438_v2, %v2437_v55  ;;  %v2487_v10 = vadd.f32 %v2486_v3, %v2485_v56 }
 0x1f8   : > { %v813_v14 = vadd.f32 %v2436_v0, %v3771_v9  ;;  %v877_v7 = vadd.f32 %v2484_v1, %v3771_v9 }
 0x1f9   : > { %v3841_v49 = vpack.c.bf16 %v986_v4, %v985_v59  ;;  %v3843_v47 = vpack.c.bf16 %v1002_v5, %v1001_v60  ;;  %v816_v13 = vadd.f32 %v2439_v8, %v3771_v9  ;;  %v880_v6 = vadd.f32 %v2487_v10, %v3771_v9 }
 0x1fa   : > { %v915_v15 = vmax.f32 %v813_v14, 0.0  ;;  %v931_v50 = vmax.f32 %v877_v7, 0.0 }
 0x1fb   : > { %v916_v51 = vmax.f32 %v816_v13, 0.0  ;;  %v932_v52 = vmax.f32 %v880_v6, 0.0  ;;  %v2440_v53 = vpop.f32.mrb[20].mxu0  ;;  %v2488_v54 = vpop.f32.mrb[20].mxu1 }
 0x1fc   : > { %v951_v55 = vmul.f32 %v3774_v16, %v915_v15  ;;  %v967_v56 = vmul.f32 %v3774_v16, %v931_v50  ;;  %v2441_v0 = vpop.f32.mrb[21].mxu0  ;;  %v2489_v1 = vpop.f32.mrb[21].mxu1 }
 0x1fd   : > { %v952_v59 = vmul.f32 %v3774_v16, %v916_v51  ;;  %v968_v60 = vmul.f32 %v3774_v16, %v932_v52  ;;  %v2442_v2 = vadd.f32 %v2441_v0, %v2440_v53  ;;  %v2490_v3 = vadd.f32 %v2489_v1, %v2488_v54  ;;  %v2443_v4 = vpop.f32.mrb[22].mxu0  ;;  %v2491_v5 = vpop.f32.mrb[22].mxu1 }
 0x1fe   : > { %v987_v8 = vadd.f32 %v3781_v61, %v951_v55  ;;  %v1003_v10 = vadd.f32 %v3781_v61, %v967_v56  ;;  %v2444_v14 = vpop.f32.mrb[23].mxu0  ;;  %v2492_v7 = vpop.f32.mrb[23].mxu1 }
 0x1ff   : > { %v988_v13 = vadd.f32 %v3781_v61, %v952_v59  ;;  %v1004_v6 = vadd.f32 %v3781_v61, %v968_v60  ;;  %v821_v15 = vadd.f32 %v2442_v2, %v3771_v9  ;;  %v885_v50 = vadd.f32 %v2490_v3, %v3771_v9 }
 0x200   : > { %v2445_v51 = vadd.f32 %v2444_v14, %v2443_v4  ;;  %v2493_v52 = vadd.f32 %v2492_v7, %v2491_v5 }
 0x201   : > { %v3857_v53 = vpack.c.bf16 %v988_v13, %v987_v8  ;;  %v3859_v54 = vpack.c.bf16 %v1004_v6, %v1003_v10  ;;  %v917_v0 = vmax.f32 %v821_v15, 0.0  ;;  %v933_v55 = vmax.f32 %v885_v50, 0.0 }
 0x202   : > { %v824_v56 = vadd.f32 %v2445_v51, %v3771_v9  ;;  %v888_v1 = vadd.f32 %v2493_v52, %v3771_v9 }
 0x203   : > { %v2446_v48 = vpop.f32.mrb[24].mxu0  ;;  %v2494_v59 = vpop.f32.mrb[24].mxu1  ;;  %v953_v60 = vmul.f32 %v3774_v16, %v917_v0  ;;  %v969_v2 = vmul.f32 %v3774_v16, %v933_v55 }
 0x204   : > { %v918_v31 = vmax.f32 %v824_v56, 0.0  ;;  %v934_v3 = vmax.f32 %v888_v1, 0.0  ;;  %v2447_v4 = vpop.f32.mrb[25].mxu0  ;;  %v2495_v5 = vpop.f32.mrb[25].mxu1 }
 0x205   : > { %v2448_v8 = vadd.f32 %v2447_v4, %v2446_v48  ;;  %v2496_v14 = vadd.f32 %v2495_v5, %v2494_v59  ;;  %v2449_v10 = vpop.f32.mrb[26].mxu0  ;;  %v2497_v7 = vpop.f32.mrb[26].mxu1  ;;  %v989_v56 = vadd.f32 %v3781_v61, %v953_v60  ;;  %v1005_v1 = vadd.f32 %v3781_v61, %v969_v2 }
 0x206   : > { %v954_v13 = vmul.f32 %v3774_v16, %v918_v31  ;;  %v970_v6 = vmul.f32 %v3774_v16, %v934_v3  ;;  %v2450_v15 = vpop.f32.mrb[27].mxu0  ;;  %v2498_v50 = vpop.f32.mrb[27].mxu1 }
 0x207   : > { %v829_v51 = vadd.f32 %v2448_v8, %v3771_v9  ;;  %v893_v52 = vadd.f32 %v2496_v14, %v3771_v9  ;;  %v2451_v0 = vadd.f32 %v2450_v15, %v2449_v10  ;;  %v2499_v55 = vadd.f32 %v2498_v50, %v2497_v7 }
 0x208   : > { %v990_v48 = vadd.f32 %v3781_v61, %v954_v13  ;;  %v1006_v59 = vadd.f32 %v3781_v61, %v970_v6 }
 0x209   : > { %v919_v4 = vmax.f32 %v829_v51, 0.0  ;;  %v935_v31 = vmax.f32 %v893_v52, 0.0  ;;  %v832_v3 = vadd.f32 %v2451_v0, %v3771_v9  ;;  %v896_v5 = vadd.f32 %v2499_v55, %v3771_v9 }
 0x20a   : > { %v3875_v32 = vpack.c.bf16 %v990_v48, %v989_v56  ;;  %v3877_v8 = vpack.c.bf16 %v1006_v59, %v1005_v1 }
 0x20b   : > { %v955_v14 = vmul.f32 %v3774_v16, %v919_v4  ;;  %v971_v60 = vmul.f32 %v3774_v16, %v935_v31  ;;  %v920_v10 = vmax.f32 %v832_v3, 0.0  ;;  %v936_v2 = vmax.f32 %v896_v5, 0.0  ;;  %v2452_v7 = vpop.f32.mrb[28].mxu0  ;;  %v2500_v13 = vpop.f32.mrb[28].mxu1 }
 0x20c   : > { %v2453_v15 = vpop.f32.mrb[29].mxu0  ;;  %v2501_v6 = vpop.f32.mrb[29].mxu1 }
 0x20d   : > { %v956_v50 = vmul.f32 %v3774_v16, %v920_v10  ;;  %v972_v51 = vmul.f32 %v3774_v16, %v936_v2  ;;  %v2455_v52 = vpop.f32.mrb[30].mxu0  ;;  %v2503_v0 = vpop.f32.mrb[30].mxu1  ;;  %v991_v55 = vadd.f32 %v3781_v61, %v955_v14  ;;  %v1007_v56 = vadd.f32 %v3781_v61, %v971_v60 }
 0x20e   : > { %v2454_v1 = vadd.f32 %v2453_v15, %v2452_v7  ;;  %v2502_v48 = vadd.f32 %v2501_v6, %v2500_v13  ;;  %v2456_v59 = vpop.f32.mrb[31].mxu0  ;;  %v2504_v4 = vpop.f32.mrb[31].mxu1 }
 0x20f   : > { %v992_v31 = vadd.f32 %v3781_v61, %v956_v50  ;;  %v1008_v3 = vadd.f32 %v3781_v61, %v972_v51  ;;  %v2457_v5 = vadd.f32 %v2456_v59, %v2455_v52  ;;  %v2505_v45 = vadd.f32 %v2504_v4, %v2503_v0  ;;  %v3014_v59 = vld [vmem:[%s3612_s11 + $0x8] sm:$0xff] (!%p361_p3)   ;;  %v3016_v4 = vld [vmem:[%s3612_s11 + $0x18] sm:$0xff] (!%p361_p3)  }
 0x210   : > { %v837_v10 = vadd.f32 %v2454_v1, %v3771_v9  ;;  %v901_v2 = vadd.f32 %v2502_v48, %v3771_v9 }
 0x211   : > { %v3889_v46 = vpack.c.bf16 %v992_v31, %v991_v55  ;;  %v3891_v29 = vpack.c.bf16 %v1008_v3, %v1007_v56  ;;  %v840_v14 = vadd.f32 %v2457_v5, %v3771_v9  ;;  %v904_v60 = vadd.f32 %v2505_v45, %v3771_v9  ;;  %v3017_v31 = vld [vmem:[%s3612_s11 + $0x20] sm:$0xff] (!%p361_p3)   ;;  %v3018_v3 = vld [vmem:[%s3612_s11 + $0x28] sm:$0xff] (!%p361_p3)   ;;  %v3019_v5 = vld [vmem:[%s3612_s11 + $0x30] sm:$0xff] (!%p361_p3)  }
 0x212   : > { %v921_v7 = vmax.f32 %v837_v10, 0.0  ;;  %v937_v13 = vmax.f32 %v901_v2, 0.0  ;;  %v3020_v10 = vld [vmem:[%s3612_s11 + $0x38] sm:$0xff] (!%p361_p3)  }
 0x213   : > { %v922_v15 = vmax.f32 %v840_v14, 0.0  ;;  %v938_v6 = vmax.f32 %v904_v60, 0.0  ;;  %1030 = sbr.rel (%p361_p3) target bundleno = 808 (0x328), region = 76 }
 0x214   : > { %v957_v50 = vmul.f32 %v3774_v16, %v921_v7  ;;  %v973_v51 = vmul.f32 %v3774_v16, %v937_v13 }
 0x215   : > { %v958_v52 = vmul.f32 %v3774_v16, %v922_v15  ;;  %v974_v0 = vmul.f32 %v3774_v16, %v938_v6  ;;  %v3013_v16 = vld [vmem:[%s3612_s11] sm:$0xff] (!%p361_p3)  }
 0x216   : > { %v993_v55 = vadd.f32 %v3781_v61, %v957_v50  ;;  %v1009_v56 = vadd.f32 %v3781_v61, %v973_v51  ;;  %2710 = vmatprep.subr.bf16.mxu0 (!%p361_p3), %v3013_v16  ;;  %2822 = vmatprep.subr.bf16.mxu1 (!%p361_p3), %v3013_v16 }
 0x217   : > { %v994_v1 = vadd.f32 %v3781_v61, %v958_v52  ;;  %v1010_v45 = vadd.f32 %v3781_v61, %v974_v0  ;;  %2711 = vmatpush3.bf16.msra.mxu0 (!%p361_p3), %v3013_v16  ;;  %2830 = vmatpush3.bf16.msra.mxu1 (!%p361_p3), %v3013_v16  ;;  %v3015_v61 = vld [vmem:[%s3612_s11 + $0x10] sm:$0xff] (!%p361_p3)  }
 0x218   : > { %2712 = vmatprep.subr.bf16.mxu0 (!%p361_p3), %v3014_v59  ;;  %2823 = vmatprep.subr.bf16.mxu1 (!%p361_p3), %v3014_v59 }
 0x219   : > { %v3903_v9 = vpack.c.bf16 %v994_v1, %v993_v55  ;;  %v3905_v48 = vpack.c.bf16 %v1010_v45, %v1009_v56 }
 0x21b   : > { %2713 = vmatpush3.bf16.msra.mxu0 %v3014_v59  ;;  %2831 = vmatpush3.bf16.msra.mxu1 %v3014_v59 }
 0x21c   : > { %2714 = vmatprep.subr.bf16.mxu0 %v3015_v61  ;;  %2824 = vmatprep.subr.bf16.mxu1 %v3015_v61 }
 0x21f   : > { %2715 = vmatpush3.bf16.msra.mxu0 %v3015_v61  ;;  %2832 = vmatpush3.bf16.msra.mxu1 %v3015_v61 }
 0x220   : > { %2716 = vmatprep.subr.bf16.mxu0 %v3016_v4  ;;  %2825 = vmatprep.subr.bf16.mxu1 %v3016_v4 }
 0x223   : > { %2717 = vmatpush3.bf16.msra.mxu0 %v3016_v4  ;;  %2833 = vmatpush3.bf16.msra.mxu1 %v3016_v4 }
 0x224   : > { %2718 = vmatprep.subr.bf16.mxu0 %v3017_v31  ;;  %2826 = vmatprep.subr.bf16.mxu1 %v3017_v31 }
 0x227   : > { %2719 = vmatpush3.bf16.msra.mxu0 %v3017_v31  ;;  %2834 = vmatpush3.bf16.msra.mxu1 %v3017_v31 }
 0x228   : > { %2720 = vmatprep.subr.bf16.mxu0 %v3018_v3  ;;  %2827 = vmatprep.subr.bf16.mxu1 %v3018_v3 }
 0x22b   : > { %2721 = vmatpush3.bf16.msra.mxu0 %v3018_v3  ;;  %2835 = vmatpush3.bf16.msra.mxu1 %v3018_v3 }
 0x22c   : > { %2722 = vmatprep.subr.bf16.mxu0 %v3019_v5  ;;  %2828 = vmatprep.subr.bf16.mxu1 %v3019_v5 }
 0x22f   : > { %2723 = vmatpush3.bf16.msra.mxu0 %v3019_v5  ;;  %2836 = vmatpush3.bf16.msra.mxu1 %v3019_v5 }
 0x230   : > { %2724 = vmatprep.subr.bf16.mxu0 %v3020_v10  ;;  %2829 = vmatprep.subr.bf16.mxu1 %v3020_v10 }
 0x233   : > { %2725 = vmatpush3.bf16.msra.mxu0 %v3020_v10  ;;  %2837 = vmatpush3.bf16.msra.mxu1 %v3020_v10 }
 0x236   : > { %2727 = vmatmul.mubr.bf16.vlgmr.msra.gmra.mrb[0].mxu0 %v3809_v62  ;;  %2743 = vmatmul.mubr.bf16.vlgmr.msra.gmra.mrb[0].mxu1 %v3811_v63 }
 0x237   : > { %2730 = vmatprep.mubr.bf16.mxu0 %v3827_v11  ;;  %2746 = vmatprep.mubr.bf16.mxu1 %v3829_v12 }
 0x23e   : > { %2731 = vmatmul.mubr.bf16.gmra.mrb[4].mxu0 %v3841_v49  ;;  %2747 = vmatmul.mubr.bf16.gmra.mrb[4].mxu1 %v3843_v47 }
 0x23f   : > { %2734 = vmatprep.mubr.bf16.mxu0 %v3857_v53  ;;  %2750 = vmatprep.mubr.bf16.mxu1 %v3859_v54 }
 0x246   : > { %2735 = vmatmul.mubr.bf16.gmra.mrb[8].mxu0 %v3875_v32  ;;  %2751 = vmatmul.mubr.bf16.gmra.mrb[8].mxu1 %v3877_v8 }
 0x247   : > { %2738 = vmatprep.mubr.bf16.mxu0 %v3889_v46  ;;  %2754 = vmatprep.mubr.bf16.mxu1 %v3891_v29 }
 0x24e   : > { %2739 = vmatmul.mubr.bf16.gmra.mrb[12].mxu0 %v3903_v9  ;;  %2755 = vmatmul.mubr.bf16.gmra.mrb[12].mxu1 %v3905_v48 }
 0x309   : > { %v2728_v2 = vpop.f32.mrb[0].mxu0  ;;  %v2744_v14 = vpop.f32.mrb[0].mxu1 }
 0x30a   : > { %v1129_v60 = vpop.f32.mrb[1].mxu0  ;;  %v1193_v7 = vpop.f32.mrb[1].mxu1 }
 0x30b   : > { %v2729_v13 = vpop.f32.mrb[2].mxu0  ;;  %v2745_v15 = vpop.f32.mrb[2].mxu1 }
 0x30c   : > { %v1257_v6 = vpack.c.bf16 %v2729_v13, %v2728_v2  ;;  %v1265_v50 = vpack.c.bf16 %v2745_v15, %v2744_v14  ;;  %v1132_v51 = vpop.f32.mrb[3].mxu0  ;;  %v1196_v52 = vpop.f32.mrb[3].mxu1 }
 0x30d   : > { %v1256_v0 = vpack.c.bf16 %v1132_v51, %v1129_v60  ;;  %v1264_v55 = vpack.c.bf16 %v1196_v52, %v1193_v7 }
 0x30e   : > { %1277 = vst [vmem:[#allocation3 + $0x8] sm:$0xff] %v1257_v6  ;;  %1285 = vst [vmem:[#allocation3 + $0x48] sm:$0xff] %v1265_v50 }
 0x30f   : > { %1276 = vst [vmem:[#allocation3] sm:$0xff] %v1256_v0  ;;  %1284 = vst [vmem:[#allocation3 + $0x40] sm:$0xff] %v1264_v55 }
 0x311   : > { %v2732_v56 = vpop.f32.mrb[4].mxu0  ;;  %v2748_v1 = vpop.f32.mrb[4].mxu1 }
 0x312   : > { %v1145_v45 = vpop.f32.mrb[5].mxu0  ;;  %v1209_v16 = vpop.f32.mrb[5].mxu1 }
 0x313   : > { %v2733_v59 = vpop.f32.mrb[6].mxu0  ;;  %v2749_v61 = vpop.f32.mrb[6].mxu1 }
 0x314   : > { %v1259_v4 = vpack.c.bf16 %v2733_v59, %v2732_v56  ;;  %v1267_v31 = vpack.c.bf16 %v2749_v61, %v2748_v1  ;;  %v1148_v3 = vpop.f32.mrb[7].mxu0  ;;  %v1212_v5 = vpop.f32.mrb[7].mxu1 }
 0x315   : > { %v1258_v10 = vpack.c.bf16 %v1148_v3, %v1145_v45  ;;  %v1266_v2 = vpack.c.bf16 %v1212_v5, %v1209_v16 }
 0x316   : > { %1279 = vst [vmem:[#allocation3 + $0x18] sm:$0xff] %v1259_v4  ;;  %1287 = vst [vmem:[#allocation3 + $0x58] sm:$0xff] %v1267_v31 }
 0x317   : > { %1278 = vst [vmem:[#allocation3 + $0x10] sm:$0xff] %v1258_v10  ;;  %1286 = vst [vmem:[#allocation3 + $0x50] sm:$0xff] %v1266_v2 }
 0x319   : > { %v2736_v14 = vpop.f32.mrb[8].mxu0  ;;  %v2752_v60 = vpop.f32.mrb[8].mxu1 }
 0x31a   : > { %v1161_v7 = vpop.f32.mrb[9].mxu0  ;;  %v1225_v13 = vpop.f32.mrb[9].mxu1 }
 0x31b   : > { %v2737_v15 = vpop.f32.mrb[10].mxu0  ;;  %v2753_v6 = vpop.f32.mrb[10].mxu1 }
 0x31c   : > { %v1261_v50 = vpack.c.bf16 %v2737_v15, %v2736_v14  ;;  %v1269_v51 = vpack.c.bf16 %v2753_v6, %v2752_v60  ;;  %v1164_v52 = vpop.f32.mrb[11].mxu0  ;;  %v1228_v0 = vpop.f32.mrb[11].mxu1 }
 0x31d   : > { %v1260_v55 = vpack.c.bf16 %v1164_v52, %v1161_v7  ;;  %v1268_v56 = vpack.c.bf16 %v1228_v0, %v1225_v13 }
 0x31e   : > { %1281 = vst [vmem:[#allocation3 + $0x28] sm:$0xff] %v1261_v50  ;;  %1289 = vst [vmem:[#allocation3 + $0x68] sm:$0xff] %v1269_v51 }
 0x31f   : > { %1280 = vst [vmem:[#allocation3 + $0x20] sm:$0xff] %v1260_v55  ;;  %1288 = vst [vmem:[#allocation3 + $0x60] sm:$0xff] %v1268_v56 }
 0x321   : > { %v2740_v1 = vpop.f32.mrb[12].mxu0  ;;  %v2756_v45 = vpop.f32.mrb[12].mxu1 }
 0x322   : > { %v1177_v16 = vpop.f32.mrb[13].mxu0  ;;  %v1241_v59 = vpop.f32.mrb[13].mxu1 }
 0x323   : > { %v2741_v61 = vpop.f32.mrb[14].mxu0  ;;  %v2757_v4 = vpop.f32.mrb[14].mxu1 }
 0x324   : > { %v1263_v31 = vpack.c.bf16 %v2741_v61, %v2740_v1  ;;  %v1271_v3 = vpack.c.bf16 %v2757_v4, %v2756_v45  ;;  %v1180_v5 = vpop.f32.mrb[15].mxu0  ;;  %v1244_v10 = vpop.f32.mrb[15].mxu1 }
 0x325   : > { %v1262_v2 = vpack.c.bf16 %v1180_v5, %v1177_v16  ;;  %v1270_v14 = vpack.c.bf16 %v1244_v10, %v1241_v59 }
 0x326   : > { %1283 = vst [vmem:[#allocation3 + $0x38] sm:$0xff] %v1263_v31  ;;  %1291 = vst [vmem:[#allocation3 + $0x78] sm:$0xff] %v1271_v3 }
 0x327   : > { %1282 = vst [vmem:[#allocation3 + $0x30] sm:$0xff] %v1262_v2  ;;  %1290 = vst [vmem:[#allocation3 + $0x70] sm:$0xff] %v1270_v14 }
 0x328 PF: > { %p2339_p12 = scmp.ne.s32.totalorder %s3289_s24, 3 }
 0x329   : > { %2530 = vmatprep.subr.bf16.mxu0 (!%p2339_p12), %v3795_v58  ;;  %v1296_v60 = vld [vmem:[#allocation9] sm:$0xff] (!%p2339_p12) }
 0x32a   : > { %1294 = sbr.rel (%p2339_p12) target bundleno = 1059 (0x423), region = 80  ;;  %2531 = vmatpush3.bf16.msra.mxu0 (!%p2339_p12), %v3793_v57  ;;  %v2341_v7 = vcombine.high (!%p2339_p12), %v1296_v60, %v1296_v60  ;;  %v2340_v57 = vcombine.low (!%p2339_p12), %v1296_v60, %v1296_v60 }
 0x32b   : > { %2532 = vmatprep.subr.bf16.mxu0 (!%p2339_p12), %v3811_v63 }
 0x32c   : > { %1336 = vmatprep.mubr.bf16.mxu0 (!%p2339_p12), %v2341_v7 }
 0x32e   : > { %2533 = vmatpush3.bf16.msra.mxu0 (!%p2339_p12), %v3809_v62 }
 0x32f   : > { %2534 = vmatprep.subr.bf16.mxu0 (!%p2339_p12), %v3829_v12 }
 0x332   : > { %2535 = vmatpush3.bf16.msra.mxu0 %v3827_v11 }
 0x333   : > { %2536 = vmatprep.subr.bf16.mxu0 %v3843_v47 }
 0x336   : > { %2537 = vmatpush3.bf16.msra.mxu0 %v3841_v49  ;;  %v1295_v49 = vld [vmem:[#allocation12] sm:$0xff] }
 0x337   : > { %2538 = vmatprep.subr.bf16.mxu0 %v3859_v54 }
 0x33a   : > { %2539 = vmatpush3.bf16.msra.mxu0 %v3857_v53 }
 0x33b   : > { %2540 = vmatprep.subr.bf16.mxu0 %v3877_v8 }
 0x33e   : > { %2541 = vmatpush3.bf16.msra.mxu0 %v3875_v32 }
 0x33f   : > { %2542 = vmatprep.subr.bf16.mxu0 %v3891_v29 }
 0x342   : > { %2543 = vmatpush3.bf16.msra.mxu0 %v3889_v46 }
 0x343   : > { %2544 = vmatprep.subr.bf16.mxu0 %v3905_v48 }
 0x346   : > { %2545 = vmatpush3.bf16.msra.mxu0 %v3903_v9 }
 0x349   : > { %1337 = vmatmul.mubr.bf16.vlgmr.msra.gmra.mrb[0].mxu0 %v2340_v57 }
 0x41c   : > { %v2546_v47 = vpop.f32.mrb[0].mxu0 }
 0x41d   : > { %v2547_v58 = vpop.f32.mrb[1].mxu0 }
 0x41e   : > { %v2548_v62 = vadd.f32 %v2547_v58, %v2546_v47  ;;  %v2549_v63 = vpop.f32.mrb[2].mxu0 }
 0x41f   : > { %v2550_v11 = vpop.f32.mrb[3].mxu0 }
 0x420   : > { %v1344_v12 = vadd.f32 %v2548_v62, %v1295_v49 }
 0x422   : > { %1345 = vst [vmem:[#allocation12] sm:$0xff] %v1344_v12 }
 0x423 PF: > { %p2342_p8 = scmp.eq.s32.totalorder %s4343_s10, 0 }
 0x424   : > { %v1358_v29 = vld [vmem:[#allocation3 + $0x40] sm:$0xff] (!%p2342_p8)  ;;  %v1359_v46 = vld [vmem:[#allocation3 + $0x48] sm:$0xff] (!%p2342_p8)  ;;  %v2344_v53 = vcombine.high (!%p2342_p8), %v3630_v17, %v3632_v18  ;;  %v2360_v54 = vcombine.high (!%p2342_p8), %v3669_v33, %v3671_v34  ;;  %v1360_v9 = vld [vmem:[#allocation3 + $0x50] sm:$0xff] (!%p2342_p8)  ;;  %v2343_v45 = vcombine.low (!%p2342_p8), %v3630_v17, %v3632_v18  ;;  %v2359_v16 = vcombine.low (!%p2342_p8), %v3669_v33, %v3671_v34 }
 0x425   : > { %1349 = sbr.rel (%p2342_p8) target bundleno = 1896 (0x768), region = 84  ;;  %v1350_v32 = vld [vmem:[#allocation3] sm:$0xff] (!%p2342_p8)  ;;  %2552 = vmatprep.subr.bf16.mxu0 (!%p2342_p8), %v1358_v29  ;;  %2838 = vmatprep.subr.bf16.mxu1 (!%p2342_p8), %v1358_v29  ;;  %v1351_v8 = vld [vmem:[#allocation3 + $0x8] sm:$0xff] (!%p2342_p8)  ;;  %v1352_v48 = vld [vmem:[#allocation3 + $0x10] sm:$0xff] (!%p2342_p8)  ;;  %v2346_v59 = vcombine.high (!%p2342_p8), %v3634_v19, %v3638_v20  ;;  %v2362_v61 = vcombine.high (!%p2342_p8), %v3673_v35, %v3675_v36  ;;  %v2345_v4 = vcombine.low (!%p2342_p8), %v3634_v19, %v3638_v20 }
 0x426   : > { %2553 = vmatpush3.bf16.msra.mxu0 (!%p2342_p8), %v1350_v32  ;;  %2846 = vmatpush3.bf16.msra.mxu1 (!%p2342_p8), %v1350_v32  ;;  %v1361_v13 = vld [vmem:[#allocation3 + $0x58] sm:$0xff] (!%p2342_p8)  ;;  %v1362_v6 = vld [vmem:[#allocation3 + $0x60] sm:$0xff] (!%p2342_p8)  ;;  %v1363_v51 = vld [vmem:[#allocation3 + $0x68] sm:$0xff] (!%p2342_p8)  ;;  %v2361_v17 = vcombine.low (!%p2342_p8), %v3673_v35, %v3675_v36  ;;  %v2348_v18 = vcombine.high (!%p2342_p8), %v3640_v21, %v3642_v22  ;;  %v2364_v33 = vcombine.high (!%p2342_p8), %v3677_v37, %v3679_v38 }
 0x427   : > { %2554 = vmatprep.subr.bf16.mxu0 (!%p2342_p8), %v1359_v46  ;;  %2839 = vmatprep.subr.bf16.mxu1 (!%p2342_p8), %v1359_v46  ;;  %v1353_v15 = vld [vmem:[#allocation3 + $0x18] sm:$0xff] (!%p2342_p8)  ;;  %v1354_v50 = vld [vmem:[#allocation3 + $0x20] sm:$0xff] (!%p2342_p8)  ;;  %v1355_v52 = vld [vmem:[#allocation3 + $0x28] sm:$0xff] (!%p2342_p8)  ;;  %v2347_v34 = vcombine.low (!%p2342_p8), %v3640_v21, %v3642_v22  ;;  %v2363_v31 = vcombine.low (!%p2342_p8), %v3677_v37, %v3679_v38  ;;  %v2350_v19 = vcombine.high (!%p2342_p8), %v3645_v23, %v3647_v24 }
 0x428   : > { %1562 = vmatprep.mubr.bf16.mxu0 (!%p2342_p8), %v2344_v53  ;;  %1626 = vmatprep.mubr.bf16.mxu1 (!%p2342_p8), %v2360_v54  ;;  %v1364_v0 = vld [vmem:[#allocation3 + $0x70] sm:$0xff] (!%p2342_p8)  ;;  %v1365_v56 = vld [vmem:[#allocation3 + $0x78] sm:$0xff] (!%p2342_p8)  ;;  %v2366_v20 = vcombine.high (!%p2342_p8), %v3681_v39, %v3683_v40  ;;  %v2349_v35 = vcombine.low (!%p2342_p8), %v3645_v23, %v3647_v24  ;;  %v2365_v36 = vcombine.low (!%p2342_p8), %v3681_v39, %v3683_v40  ;;  %v4327_v63 = vld [vmem:[#allocation26_spill] sm:$0xff] (!%p2342_p8) }
 0x429   : > { %v1356_v55 = vld [vmem:[#allocation3 + $0x30] sm:$0xff] (!%p2342_p8)  ;;  %v1357_v1 = vld [vmem:[#allocation3 + $0x38] sm:$0xff] (!%p2342_p8)  ;;  %v2352_v21 = vcombine.high (!%p2342_p8), %v3649_v25, %v3651_v26  ;;  %v2368_v22 = vcombine.high (!%p2342_p8), %v3685_v41, %v3687_v42  ;;  %v2351_v37 = vcombine.low (!%p2342_p8), %v3649_v25, %v3651_v26  ;;  %v2367_v38 = vcombine.low (!%p2342_p8), %v3685_v41, %v3687_v42  ;;  %v4320_v25 = vld [vmem:[#allocation19_spill] sm:$0xff] (!%p2342_p8) }
 0x42a   : > { %2555 = vmatpush3.bf16.msra.mxu0 (!%p2342_p8), %v1351_v8  ;;  %2847 = vmatpush3.bf16.msra.mxu1 (!%p2342_p8), %v1351_v8  ;;  %v2354_v23 = vcombine.high (!%p2342_p8), %v3653_v27, %v3655_v28  ;;  %v2370_v24 = vcombine.high (!%p2342_p8), %v3689_v43, %v3691_v44  ;;  %v2353_v39 = vcombine.low (!%p2342_p8), %v3653_v27, %v3655_v28  ;;  %v4321_v41 = vld [vmem:[#allocation23_spill] sm:$0xff] (!%p2342_p8)  ;;  %v4322_v42 = vld [vmem:[#allocation22_spill] sm:$0xff] (!%p2342_p8)  ;;  %v4323_v27 = vld [vmem:[#allocation21_spill] sm:$0xff] (!%p2342_p8) }
 0x42b   : > { %2556 = vmatprep.subr.bf16.mxu0 (!%p2342_p8), %v1360_v9  ;;  %2840 = vmatprep.subr.bf16.mxu1 (!%p2342_p8), %v1360_v9  ;;  %v2369_v40 = vcombine.low (!%p2342_p8), %v3689_v43, %v3691_v44  ;;  %v2356_v26 = vcombine.high (!%p2342_p8), %v4320_v25, %v3659_v30  ;;  %v2372_v3 = vcombine.high (!%p2342_p8), %v4322_v42, %v4321_v41  ;;  %v4324_v28 = vld [vmem:[#allocation20_spill] sm:$0xff] (!%p2342_p8)  ;;  %v4325_v43 = vld [vmem:[#allocation25_spill] sm:$0xff] (!%p2342_p8) }
 0x42c   : > { %v2355_v5 = vcombine.low %v4320_v25, %v3659_v30  ;;  %v2371_v10 = vcombine.low %v4322_v42, %v4321_v41  ;;  %v2358_v2 = vcombine.high %v4324_v28, %v4323_v27  ;;  %v4326_v44 = vld [vmem:[#allocation24_spill] sm:$0xff]  ;;  %v2357_v60 = vcombine.low %v4324_v28, %v4323_v27 }
 0x42d   : > { %v2374_v14 = vcombine.high %v4326_v44, %v4325_v43  ;;  %v2373_v7 = vcombine.low %v4326_v44, %v4325_v43  ;;  %v1366_v30 = vlaneseq }
 0x42e   : > { %2557 = vmatpush3.bf16.msra.mxu0 %v1352_v48  ;;  %2848 = vmatpush3.bf16.msra.mxu1 %v1352_v48 }
 0x42f   : > { %2558 = vmatprep.subr.bf16.mxu0 %v1361_v13  ;;  %2841 = vmatprep.subr.bf16.mxu1 %v1361_v13  ;;  %v1367_v57 = vshrl.u32 %v1366_v30, 7 }
 0x431   : > { %v1368_v47 = vsub.s32 0, %v1367_v57  ;;  %v1725_v49 = vsub.s32 1, %v1367_v57  ;;  %v1761_v9 = vsub.s32 2, %v1367_v57 }
 0x432   : > { %2559 = vmatpush3.bf16.msra.mxu0 %v1353_v15  ;;  %2849 = vmatpush3.bf16.msra.mxu1 %v1353_v15 }
 0x433   : > { %2560 = vmatprep.subr.bf16.mxu0 %v1362_v6  ;;  %2842 = vmatprep.subr.bf16.mxu1 %v1362_v6  ;;  %v4016_v11 = vrot.slane %v4327_v63, %v1368_v47  ;;  %v4019_v8 = vrot.slane %v4327_v63, %v1725_v49 }
 0x436   : > { %2561 = vmatpush3.bf16.msra.mxu0 %v1354_v50  ;;  %2850 = vmatpush3.bf16.msra.mxu1 %v1354_v50 }
 0x437   : > { %2562 = vmatprep.subr.bf16.mxu0 %v1363_v51  ;;  %2843 = vmatprep.subr.bf16.mxu1 %v1363_v51 }
 0x43a   : > { %2563 = vmatpush3.bf16.msra.mxu0 %v1355_v52  ;;  %2851 = vmatpush3.bf16.msra.mxu1 %v1355_v52 }
 0x43b   : > { %2564 = vmatprep.subr.bf16.mxu0 %v1364_v0  ;;  %2844 = vmatprep.subr.bf16.mxu1 %v1364_v0 }
 0x43e   : > { %2565 = vmatpush3.bf16.msra.mxu0 %v1356_v55  ;;  %2852 = vmatpush3.bf16.msra.mxu1 %v1356_v55 }
 0x43f   : > { %2566 = vmatprep.subr.bf16.mxu0 %v1365_v56  ;;  %2845 = vmatprep.subr.bf16.mxu1 %v1365_v56 }
 0x442   : > { %2567 = vmatpush3.bf16.msra.mxu0 %v1357_v1  ;;  %2853 = vmatpush3.bf16.msra.mxu1 %v1357_v1  ;;  %v4026_v1 = vrot.slane %v4327_v63, %v1761_v9 }
 0x445   : > { %1563 = vmatmul.mubr.bf16.vlgmr.msra.gmra.mrb[0].mxu0 %v2343_v45  ;;  %1627 = vmatmul.mubr.bf16.vlgmr.msra.gmra.mrb[0].mxu1 %v2359_v16 }
 0x446   : > { %1570 = vmatprep.mubr.bf16.mxu0 %v2346_v59  ;;  %1634 = vmatprep.mubr.bf16.mxu1 %v2362_v61 }
 0x44d   : > { %1571 = vmatmul.mubr.bf16.gmra.mrb[4].mxu0 %v2345_v4  ;;  %1635 = vmatmul.mubr.bf16.gmra.mrb[4].mxu1 %v2361_v17 }
 0x44e   : > { %1578 = vmatprep.mubr.bf16.mxu0 %v2348_v18  ;;  %1642 = vmatprep.mubr.bf16.mxu1 %v2364_v33 }
 0x455   : > { %1579 = vmatmul.mubr.bf16.gmra.mrb[8].mxu0 %v2347_v34  ;;  %1643 = vmatmul.mubr.bf16.gmra.mrb[8].mxu1 %v2363_v31 }
 0x456   : > { %1586 = vmatprep.mubr.bf16.mxu0 %v2350_v19  ;;  %1650 = vmatprep.mubr.bf16.mxu1 %v2366_v20 }
 0x45d   : > { %1587 = vmatmul.mubr.bf16.gmra.mrb[12].mxu0 %v2349_v35  ;;  %1651 = vmatmul.mubr.bf16.gmra.mrb[12].mxu1 %v2365_v36 }
 0x45e   : > { %1594 = vmatprep.mubr.bf16.mxu0 %v2352_v21  ;;  %1658 = vmatprep.mubr.bf16.mxu1 %v2368_v22 }
 0x465   : > { %1595 = vmatmul.mubr.bf16.gmra.mrb[16].mxu0 %v2351_v37  ;;  %1659 = vmatmul.mubr.bf16.gmra.mrb[16].mxu1 %v2367_v38 }
 0x466   : > { %1602 = vmatprep.mubr.bf16.mxu0 %v2354_v23  ;;  %1666 = vmatprep.mubr.bf16.mxu1 %v2370_v24 }
 0x46d   : > { %1603 = vmatmul.mubr.bf16.gmra.mrb[20].mxu0 %v2353_v39  ;;  %1667 = vmatmul.mubr.bf16.gmra.mrb[20].mxu1 %v2369_v40 }
 0x46e   : > { %1610 = vmatprep.mubr.bf16.mxu0 %v2356_v26  ;;  %1674 = vmatprep.mubr.bf16.mxu1 %v2372_v3 }
 0x475   : > { %1611 = vmatmul.mubr.bf16.gmra.mrb[24].mxu0 %v2355_v5  ;;  %1675 = vmatmul.mubr.bf16.gmra.mrb[24].mxu1 %v2371_v10 }
 0x476   : > { %1618 = vmatprep.mubr.bf16.mxu0 %v2358_v2  ;;  %1682 = vmatprep.mubr.bf16.mxu1 %v2374_v14 }
 0x47d   : > { %1619 = vmatmul.mubr.bf16.gmra.mrb[28].mxu0 %v2357_v60  ;;  %1683 = vmatmul.mubr.bf16.gmra.mrb[28].mxu1 %v2373_v7 }
 0x518   : > { %v2568_v58 = vpop.f32.mrb[0].mxu0  ;;  %v2616_v62 = vpop.f32.mrb[0].mxu1 }
 0x519   : > { %v2569_v12 = vpop.f32.mrb[1].mxu0  ;;  %v2617_v29 = vpop.f32.mrb[1].mxu1 }
 0x51a   : > { %v2570_v32 = vadd.f32 %v2569_v12, %v2568_v58  ;;  %v2618_v46 = vadd.f32 %v2617_v29, %v2616_v62  ;;  %v2571_v53 = vpop.f32.mrb[2].mxu0  ;;  %v2619_v54 = vpop.f32.mrb[2].mxu1 }
 0x51b   : > { %v2572_v48 = vpop.f32.mrb[3].mxu0  ;;  %v2620_v13 = vpop.f32.mrb[3].mxu1 }
 0x51c   : > { %v1565_v15 = vadd.f32 %v2570_v32, %v4016_v11  ;;  %v1629_v6 = vadd.f32 %v2618_v46, %v4016_v11  ;;  %v2573_v50 = vadd.f32 %v2572_v48, %v2571_v53  ;;  %v2621_v51 = vadd.f32 %v2620_v13, %v2619_v54 }
 0x51e   : > { %v1691_v52 = vmax.f32 %v1565_v15, 0.0  ;;  %v1707_v0 = vmax.f32 %v1629_v6, 0.0  ;;  %v1568_v55 = vadd.f32 %v2573_v50, %v4016_v11  ;;  %v1632_v56 = vadd.f32 %v2621_v51, %v4016_v11 }
 0x520   : > { %v1727_v45 = vmul.f32 %v4019_v8, %v1691_v52  ;;  %v1743_v16 = vmul.f32 %v4019_v8, %v1707_v0  ;;  %v1692_v59 = vmax.f32 %v1568_v55, 0.0  ;;  %v1708_v61 = vmax.f32 %v1632_v56, 0.0  ;;  %v2574_v4 = vpop.f32.mrb[4].mxu0  ;;  %v2622_v17 = vpop.f32.mrb[4].mxu1 }
 0x521   : > { %v2575_v18 = vpop.f32.mrb[5].mxu0  ;;  %v2623_v33 = vpop.f32.mrb[5].mxu1 }
 0x522   : > { %v1728_v34 = vmul.f32 %v4019_v8, %v1692_v59  ;;  %v1744_v31 = vmul.f32 %v4019_v8, %v1708_v61  ;;  %v2577_v19 = vpop.f32.mrb[6].mxu0  ;;  %v2625_v20 = vpop.f32.mrb[6].mxu1  ;;  %v1763_v35 = vadd.f32 %v4026_v1, %v1727_v45  ;;  %v1779_v36 = vadd.f32 %v4026_v1, %v1743_v16 }
 0x523   : > { %v2576_v21 = vadd.f32 %v2575_v18, %v2574_v4  ;;  %v2624_v22 = vadd.f32 %v2623_v33, %v2622_v17  ;;  %v2578_v37 = vpop.f32.mrb[7].mxu0  ;;  %v2626_v38 = vpop.f32.mrb[7].mxu1 }
 0x524   : > { %v1764_v23 = vadd.f32 %v4026_v1, %v1728_v34  ;;  %v1780_v24 = vadd.f32 %v4026_v1, %v1744_v31  ;;  %v2579_v39 = vadd.f32 %v2578_v37, %v2577_v19  ;;  %v2627_v40 = vadd.f32 %v2626_v38, %v2625_v20 }
 0x525   : > { %v1573_v25 = vadd.f32 %v2576_v21, %v4016_v11  ;;  %v1637_v26 = vadd.f32 %v2624_v22, %v4016_v11 }
 0x526   : > { %v4038_v41 = vpack.c.bf16 %v1764_v23, %v1763_v35  ;;  %v4040_v42 = vpack.c.bf16 %v1780_v24, %v1779_v36  ;;  %v1576_v3 = vadd.f32 %v2579_v39, %v4016_v11  ;;  %v1640_v5 = vadd.f32 %v2627_v40, %v4016_v11 }
 0x527   : > { %v1693_v10 = vmax.f32 %v1573_v25, 0.0  ;;  %v1709_v27 = vmax.f32 %v1637_v26, 0.0 }
 0x528   : > { %v1694_v28 = vmax.f32 %v1576_v3, 0.0  ;;  %v1710_v2 = vmax.f32 %v1640_v5, 0.0  ;;  %v2580_v43 = vpop.f32.mrb[8].mxu0  ;;  %v2628_v44 = vpop.f32.mrb[8].mxu1  ;;  %2774 = vmatprep.mubr.bf16.mxu0 (!%p361_p3), %v4038_v41  ;;  %2790 = vmatprep.mubr.bf16.mxu1 (!%p361_p3), %v4040_v42 }
 0x529   : > { %v1729_v14 = vmul.f32 %v4019_v8, %v1693_v10  ;;  %v1745_v60 = vmul.f32 %v4019_v8, %v1709_v27  ;;  %v2581_v7 = vpop.f32.mrb[9].mxu0  ;;  %v2629_v30 = vpop.f32.mrb[9].mxu1 }
 0x52a   : > { %v1730_v57 = vmul.f32 %v4019_v8, %v1694_v28  ;;  %v1746_v47 = vmul.f32 %v4019_v8, %v1710_v2  ;;  %v2582_v49 = vadd.f32 %v2581_v7, %v2580_v43  ;;  %v2630_v58 = vadd.f32 %v2629_v30, %v2628_v44  ;;  %v2583_v62 = vpop.f32.mrb[10].mxu0  ;;  %v2631_v63 = vpop.f32.mrb[10].mxu1 }
 0x52b   : > { %v1765_v12 = vadd.f32 %v4026_v1, %v1729_v14  ;;  %v1781_v29 = vadd.f32 %v4026_v1, %v1745_v60  ;;  %v2584_v32 = vpop.f32.mrb[11].mxu0  ;;  %v2632_v46 = vpop.f32.mrb[11].mxu1 }
 0x52c   : > { %v1766_v53 = vadd.f32 %v4026_v1, %v1730_v57  ;;  %v1782_v54 = vadd.f32 %v4026_v1, %v1746_v47  ;;  %v1581_v9 = vadd.f32 %v2582_v49, %v4016_v11  ;;  %v1645_v48 = vadd.f32 %v2630_v58, %v4016_v11 }
 0x52d   : > { %v2585_v13 = vadd.f32 %v2584_v32, %v2583_v62  ;;  %v2633_v15 = vadd.f32 %v2632_v46, %v2631_v63 }
 0x52e   : > { %v4054_v6 = vpack.c.bf16 %v1766_v53, %v1765_v12  ;;  %v4056_v50 = vpack.c.bf16 %v1782_v54, %v1781_v29  ;;  %v1695_v51 = vmax.f32 %v1581_v9, 0.0  ;;  %v1711_v52 = vmax.f32 %v1645_v48, 0.0 }
 0x52f   : > { %v1584_v0 = vadd.f32 %v2585_v13, %v4016_v11  ;;  %v1648_v55 = vadd.f32 %v2633_v15, %v4016_v11 }
 0x530   : > { %v2586_v56 = vpop.f32.mrb[12].mxu0  ;;  %v2634_v45 = vpop.f32.mrb[12].mxu1  ;;  %v1731_v16 = vmul.f32 %v4019_v8, %v1695_v51  ;;  %v1747_v59 = vmul.f32 %v4019_v8, %v1711_v52 }
 0x531   : > { %v1696_v61 = vmax.f32 %v1584_v0, 0.0  ;;  %v1712_v4 = vmax.f32 %v1648_v55, 0.0  ;;  %v2587_v17 = vpop.f32.mrb[13].mxu0  ;;  %v2635_v18 = vpop.f32.mrb[13].mxu1 }
 0x532   : > { %v2588_v33 = vadd.f32 %v2587_v17, %v2586_v56  ;;  %v2636_v34 = vadd.f32 %v2635_v18, %v2634_v45  ;;  %v2589_v31 = vpop.f32.mrb[14].mxu0  ;;  %v2637_v19 = vpop.f32.mrb[14].mxu1  ;;  %v1767_v24 = vadd.f32 %v4026_v1, %v1731_v16  ;;  %v1783_v39 = vadd.f32 %v4026_v1, %v1747_v59 }
 0x533   : > { %v1732_v20 = vmul.f32 %v4019_v8, %v1696_v61  ;;  %v1748_v35 = vmul.f32 %v4019_v8, %v1712_v4  ;;  %v2590_v36 = vpop.f32.mrb[15].mxu0  ;;  %v2638_v21 = vpop.f32.mrb[15].mxu1 }
 0x534   : > { %v1589_v22 = vadd.f32 %v2588_v33, %v4016_v11  ;;  %v1653_v37 = vadd.f32 %v2636_v34, %v4016_v11  ;;  %v2591_v38 = vadd.f32 %v2590_v36, %v2589_v31  ;;  %v2639_v23 = vadd.f32 %v2638_v21, %v2637_v19 }
 0x535   : > { %v1768_v40 = vadd.f32 %v4026_v1, %v1732_v20  ;;  %v1784_v25 = vadd.f32 %v4026_v1, %v1748_v35 }
 0x536   : > { %v1697_v26 = vmax.f32 %v1589_v22, 0.0  ;;  %v1713_v3 = vmax.f32 %v1653_v37, 0.0  ;;  %v1592_v5 = vadd.f32 %v2591_v38, %v4016_v11  ;;  %v1656_v10 = vadd.f32 %v2639_v23, %v4016_v11 }
 0x537   : > { %v4072_v27 = vpack.c.bf16 %v1768_v40, %v1767_v24  ;;  %v4074_v28 = vpack.c.bf16 %v1784_v25, %v1783_v39 }
 0x538   : > { %v1733_v2 = vmul.f32 %v4019_v8, %v1697_v26  ;;  %v1749_v43 = vmul.f32 %v4019_v8, %v1713_v3  ;;  %v1698_v44 = vmax.f32 %v1592_v5, 0.0  ;;  %v1714_v14 = vmax.f32 %v1656_v10, 0.0  ;;  %v2592_v60 = vpop.f32.mrb[16].mxu0  ;;  %v2640_v7 = vpop.f32.mrb[16].mxu1 }
 0x539   : > { %v2593_v30 = vpop.f32.mrb[17].mxu0  ;;  %v2641_v57 = vpop.f32.mrb[17].mxu1 }
 0x53a   : > { %v1734_v47 = vmul.f32 %v4019_v8, %v1698_v44  ;;  %v1750_v49 = vmul.f32 %v4019_v8, %v1714_v14  ;;  %v2595_v58 = vpop.f32.mrb[18].mxu0  ;;  %v2643_v62 = vpop.f32.mrb[18].mxu1  ;;  %v1769_v63 = vadd.f32 %v4026_v1, %v1733_v2  ;;  %v1785_v12 = vadd.f32 %v4026_v1, %v1749_v43 }
 0x53b   : > { %v2594_v29 = vadd.f32 %v2593_v30, %v2592_v60  ;;  %v2642_v32 = vadd.f32 %v2641_v57, %v2640_v7  ;;  %v2596_v46 = vpop.f32.mrb[19].mxu0  ;;  %v2644_v53 = vpop.f32.mrb[19].mxu1 }
 0x53c   : > { %v1770_v54 = vadd.f32 %v4026_v1, %v1734_v47  ;;  %v1786_v9 = vadd.f32 %v4026_v1, %v1750_v49  ;;  %v2597_v48 = vadd.f32 %v2596_v46, %v2595_v58  ;;  %v2645_v13 = vadd.f32 %v2644_v53, %v2643_v62 }
 0x53d   : > { %v1597_v15 = vadd.f32 %v2594_v29, %v4016_v11  ;;  %v1661_v51 = vadd.f32 %v2642_v32, %v4016_v11 }
 0x53e   : > { %v4086_v52 = vpack.c.bf16 %v1770_v54, %v1769_v63  ;;  %v4088_v0 = vpack.c.bf16 %v1786_v9, %v1785_v12  ;;  %v1600_v55 = vadd.f32 %v2597_v48, %v4016_v11  ;;  %v1664_v56 = vadd.f32 %v2645_v13, %v4016_v11 }
 0x53f   : > { %v1699_v45 = vmax.f32 %v1597_v15, 0.0  ;;  %v1715_v16 = vmax.f32 %v1661_v51, 0.0 }
 0x540   : > { %v1700_v59 = vmax.f32 %v1600_v55, 0.0  ;;  %v1716_v61 = vmax.f32 %v1664_v56, 0.0  ;;  %v2598_v4 = vpop.f32.mrb[20].mxu0  ;;  %v2646_v17 = vpop.f32.mrb[20].mxu1 }
 0x541   : > { %v1735_v18 = vmul.f32 %v4019_v8, %v1699_v45  ;;  %v1751_v33 = vmul.f32 %v4019_v8, %v1715_v16  ;;  %v2599_v34 = vpop.f32.mrb[21].mxu0  ;;  %v2647_v31 = vpop.f32.mrb[21].mxu1 }
 0x542   : > { %v1736_v19 = vmul.f32 %v4019_v8, %v1700_v59  ;;  %v1752_v20 = vmul.f32 %v4019_v8, %v1716_v61  ;;  %v2600_v35 = vadd.f32 %v2599_v34, %v2598_v4  ;;  %v2648_v36 = vadd.f32 %v2647_v31, %v2646_v17  ;;  %v2601_v21 = vpop.f32.mrb[22].mxu0  ;;  %v2649_v22 = vpop.f32.mrb[22].mxu1 }
 0x543   : > { %v1771_v37 = vadd.f32 %v4026_v1, %v1735_v18  ;;  %v1787_v38 = vadd.f32 %v4026_v1, %v1751_v33  ;;  %v2602_v23 = vpop.f32.mrb[23].mxu0  ;;  %v2650_v24 = vpop.f32.mrb[23].mxu1 }
 0x544   : > { %v1772_v39 = vadd.f32 %v4026_v1, %v1736_v19  ;;  %v1788_v40 = vadd.f32 %v4026_v1, %v1752_v20  ;;  %v1605_v25 = vadd.f32 %v2600_v35, %v4016_v11  ;;  %v1669_v26 = vadd.f32 %v2648_v36, %v4016_v11 }
 0x545   : > { %v2603_v3 = vadd.f32 %v2602_v23, %v2601_v21  ;;  %v2651_v5 = vadd.f32 %v2650_v24, %v2649_v22 }
 0x546   : > { %v4102_v10 = vpack.c.bf16 %v1772_v39, %v1771_v37  ;;  %v4104_v2 = vpack.c.bf16 %v1788_v40, %v1787_v38  ;;  %v1701_v43 = vmax.f32 %v1605_v25, 0.0  ;;  %v1717_v44 = vmax.f32 %v1669_v26, 0.0 }
 0x547   : > { %v1608_v14 = vadd.f32 %v2603_v3, %v4016_v11  ;;  %v1672_v60 = vadd.f32 %v2651_v5, %v4016_v11 }
 0x548   : > { %v2604_v7 = vpop.f32.mrb[24].mxu0  ;;  %v2652_v30 = vpop.f32.mrb[24].mxu1  ;;  %v1737_v57 = vmul.f32 %v4019_v8, %v1701_v43  ;;  %v1753_v47 = vmul.f32 %v4019_v8, %v1717_v44 }
 0x549   : > { %v1702_v49 = vmax.f32 %v1608_v14, 0.0  ;;  %v1718_v58 = vmax.f32 %v1672_v60, 0.0  ;;  %v2605_v62 = vpop.f32.mrb[25].mxu0  ;;  %v2653_v63 = vpop.f32.mrb[25].mxu1 }
 0x54a   : > { %v2606_v12 = vadd.f32 %v2605_v62, %v2604_v7  ;;  %v2654_v29 = vadd.f32 %v2653_v63, %v2652_v30  ;;  %v2607_v32 = vpop.f32.mrb[26].mxu0  ;;  %v2655_v46 = vpop.f32.mrb[26].mxu1  ;;  %v1773_v56 = vadd.f32 %v4026_v1, %v1737_v57  ;;  %v1789_v45 = vadd.f32 %v4026_v1, %v1753_v47 }
 0x54b   : > { %v1738_v53 = vmul.f32 %v4019_v8, %v1702_v49  ;;  %v1754_v54 = vmul.f32 %v4019_v8, %v1718_v58  ;;  %v2608_v9 = vpop.f32.mrb[27].mxu0  ;;  %v2656_v48 = vpop.f32.mrb[27].mxu1 }
 0x54c   : > { %v1613_v13 = vadd.f32 %v2606_v12, %v4016_v11  ;;  %v1677_v15 = vadd.f32 %v2654_v29, %v4016_v11  ;;  %v2609_v51 = vadd.f32 %v2608_v9, %v2607_v32  ;;  %v2657_v55 = vadd.f32 %v2656_v48, %v2655_v46 }
 0x54d   : > { %v1774_v16 = vadd.f32 %v4026_v1, %v1738_v53  ;;  %v1790_v59 = vadd.f32 %v4026_v1, %v1754_v54 }
 0x54e   : > { %v1703_v61 = vmax.f32 %v1613_v13, 0.0  ;;  %v1719_v4 = vmax.f32 %v1677_v15, 0.0  ;;  %v1616_v17 = vadd.f32 %v2609_v51, %v4016_v11  ;;  %v1680_v18 = vadd.f32 %v2657_v55, %v4016_v11 }
 0x54f   : > { %v4120_v33 = vpack.c.bf16 %v1774_v16, %v1773_v56  ;;  %v4122_v34 = vpack.c.bf16 %v1790_v59, %v1789_v45  ;;  %v3024_v56 = vld [vmem:[%s3612_s11 + $0x8] sm:$0xff] (!%p361_p3)   ;;  %v3026_v45 = vld [vmem:[%s3612_s11 + $0x18] sm:$0xff] (!%p361_p3)   ;;  %v3027_v16 = vld [vmem:[%s3612_s11 + $0x20] sm:$0xff] (!%p361_p3)  }
 0x550   : > { %v1739_v31 = vmul.f32 %v4019_v8, %v1703_v61  ;;  %v1755_v19 = vmul.f32 %v4019_v8, %v1719_v4  ;;  %v1704_v20 = vmax.f32 %v1616_v17, 0.0  ;;  %v1720_v35 = vmax.f32 %v1680_v18, 0.0  ;;  %v2610_v36 = vpop.f32.mrb[28].mxu0  ;;  %v2658_v21 = vpop.f32.mrb[28].mxu1  ;;  %v3028_v59 = vld [vmem:[%s3612_s11 + $0x28] sm:$0xff] (!%p361_p3)   ;;  %v3029_v61 = vld [vmem:[%s3612_s11 + $0x30] sm:$0xff] (!%p361_p3)  }
 0x551   : > { %v2611_v22 = vpop.f32.mrb[29].mxu0  ;;  %v2659_v37 = vpop.f32.mrb[29].mxu1  ;;  %v3030_v4 = vld [vmem:[%s3612_s11 + $0x38] sm:$0xff] (!%p361_p3)  }
 0x552   : > { %v1740_v38 = vmul.f32 %v4019_v8, %v1704_v20  ;;  %v1756_v23 = vmul.f32 %v4019_v8, %v1720_v35  ;;  %v2613_v24 = vpop.f32.mrb[30].mxu0  ;;  %v2661_v39 = vpop.f32.mrb[30].mxu1  ;;  %v1775_v40 = vadd.f32 %v4026_v1, %v1739_v31  ;;  %v1791_v25 = vadd.f32 %v4026_v1, %v1755_v19 }
 0x553   : > { %v2612_v26 = vadd.f32 %v2611_v22, %v2610_v36  ;;  %v2660_v3 = vadd.f32 %v2659_v37, %v2658_v21  ;;  %v2614_v5 = vpop.f32.mrb[31].mxu0  ;;  %v2662_v43 = vpop.f32.mrb[31].mxu1 }
 0x554   : > { %v1776_v44 = vadd.f32 %v4026_v1, %v1740_v38  ;;  %v1792_v14 = vadd.f32 %v4026_v1, %v1756_v23  ;;  %v2615_v60 = vadd.f32 %v2614_v5, %v2613_v24  ;;  %v2663_v7 = vadd.f32 %v2662_v43, %v2661_v39 }
 0x555   : > { %v1621_v30 = vadd.f32 %v2612_v26, %v4016_v11  ;;  %v1685_v57 = vadd.f32 %v2660_v3, %v4016_v11 }
 0x556   : > { %v4134_v47 = vpack.c.bf16 %v1776_v44, %v1775_v40  ;;  %v4136_v49 = vpack.c.bf16 %v1792_v14, %v1791_v25  ;;  %v1624_v58 = vadd.f32 %v2615_v60, %v4016_v11  ;;  %v1688_v62 = vadd.f32 %v2663_v7, %v4016_v11 }
 0x557   : > { %v1705_v63 = vmax.f32 %v1621_v30, 0.0  ;;  %v1721_v12 = vmax.f32 %v1685_v57, 0.0 }
 0x558   : > { %v1706_v29 = vmax.f32 %v1624_v58, 0.0  ;;  %v1722_v32 = vmax.f32 %v1688_v62, 0.0  ;;  %1814 = sbr.rel (%p361_p3) target bundleno = 1645 (0x66d), region = 88 }
 0x559   : > { %v1741_v46 = vmul.f32 %v4019_v8, %v1705_v63  ;;  %v1757_v53 = vmul.f32 %v4019_v8, %v1721_v12 }
 0x55a   : > { %v1742_v54 = vmul.f32 %v4019_v8, %v1706_v29  ;;  %v1758_v9 = vmul.f32 %v4019_v8, %v1722_v32  ;;  %v3023_v8 = vld [vmem:[%s3612_s11] sm:$0xff] (!%p361_p3)  }
 0x55b   : > { %v1777_v48 = vadd.f32 %v4026_v1, %v1741_v46  ;;  %v1793_v13 = vadd.f32 %v4026_v1, %v1757_v53  ;;  %2758 = vmatprep.subr.bf16.mxu0 (!%p361_p3), %v3023_v8  ;;  %2854 = vmatprep.subr.bf16.mxu1 (!%p361_p3), %v3023_v8 }
 0x55c   : > { %v1778_v15 = vadd.f32 %v4026_v1, %v1742_v54  ;;  %v1794_v11 = vadd.f32 %v4026_v1, %v1758_v9  ;;  %2759 = vmatpush3.bf16.msra.mxu0 (!%p361_p3), %v3023_v8  ;;  %2862 = vmatpush3.bf16.msra.mxu1 (!%p361_p3), %v3023_v8  ;;  %v3025_v1 = vld [vmem:[%s3612_s11 + $0x10] sm:$0xff] (!%p361_p3)  }
 0x55d   : > { %2760 = vmatprep.subr.bf16.mxu0 (!%p361_p3), %v3024_v56  ;;  %2855 = vmatprep.subr.bf16.mxu1 (!%p361_p3), %v3024_v56 }
 0x55e   : > { %v4148_v51 = vpack.c.bf16 %v1778_v15, %v1777_v48  ;;  %v4150_v55 = vpack.c.bf16 %v1794_v11, %v1793_v13 }
 0x560   : > { %2761 = vmatpush3.bf16.msra.mxu0 %v3024_v56  ;;  %2863 = vmatpush3.bf16.msra.mxu1 %v3024_v56 }
 0x561   : > { %2762 = vmatprep.subr.bf16.mxu0 %v3025_v1  ;;  %2856 = vmatprep.subr.bf16.mxu1 %v3025_v1 }
 0x564   : > { %2763 = vmatpush3.bf16.msra.mxu0 %v3025_v1  ;;  %2864 = vmatpush3.bf16.msra.mxu1 %v3025_v1 }
 0x565   : > { %2764 = vmatprep.subr.bf16.mxu0 %v3026_v45  ;;  %2857 = vmatprep.subr.bf16.mxu1 %v3026_v45 }
 0x568   : > { %2765 = vmatpush3.bf16.msra.mxu0 %v3026_v45  ;;  %2865 = vmatpush3.bf16.msra.mxu1 %v3026_v45 }
 0x569   : > { %2766 = vmatprep.subr.bf16.mxu0 %v3027_v16  ;;  %2858 = vmatprep.subr.bf16.mxu1 %v3027_v16 }
 0x56c   : > { %2767 = vmatpush3.bf16.msra.mxu0 %v3027_v16  ;;  %2866 = vmatpush3.bf16.msra.mxu1 %v3027_v16 }
 0x56d   : > { %2768 = vmatprep.subr.bf16.mxu0 %v3028_v59  ;;  %2859 = vmatprep.subr.bf16.mxu1 %v3028_v59 }
 0x570   : > { %2769 = vmatpush3.bf16.msra.mxu0 %v3028_v59  ;;  %2867 = vmatpush3.bf16.msra.mxu1 %v3028_v59 }
 0x571   : > { %2770 = vmatprep.subr.bf16.mxu0 %v3029_v61  ;;  %2860 = vmatprep.subr.bf16.mxu1 %v3029_v61 }
 0x574   : > { %2771 = vmatpush3.bf16.msra.mxu0 %v3029_v61  ;;  %2868 = vmatpush3.bf16.msra.mxu1 %v3029_v61 }
 0x575   : > { %2772 = vmatprep.subr.bf16.mxu0 %v3030_v4  ;;  %2861 = vmatprep.subr.bf16.mxu1 %v3030_v4 }
 0x578   : > { %2773 = vmatpush3.bf16.msra.mxu0 %v3030_v4  ;;  %2869 = vmatpush3.bf16.msra.mxu1 %v3030_v4 }
 0x57b   : > { %2775 = vmatmul.mubr.bf16.vlgmr.msra.gmra.mrb[0].mxu0 %v4054_v6  ;;  %2791 = vmatmul.mubr.bf16.vlgmr.msra.gmra.mrb[0].mxu1 %v4056_v50 }
 0x57c   : > { %2778 = vmatprep.mubr.bf16.mxu0 %v4072_v27  ;;  %2794 = vmatprep.mubr.bf16.mxu1 %v4074_v28 }
 0x583   : > { %2779 = vmatmul.mubr.bf16.gmra.mrb[4].mxu0 %v4086_v52  ;;  %2795 = vmatmul.mubr.bf16.gmra.mrb[4].mxu1 %v4088_v0 }
 0x584   : > { %2782 = vmatprep.mubr.bf16.mxu0 %v4102_v10  ;;  %2798 = vmatprep.mubr.bf16.mxu1 %v4104_v2 }
 0x58b   : > { %2783 = vmatmul.mubr.bf16.gmra.mrb[8].mxu0 %v4120_v33  ;;  %2799 = vmatmul.mubr.bf16.gmra.mrb[8].mxu1 %v4122_v34 }
 0x58c   : > { %2786 = vmatprep.mubr.bf16.mxu0 %v4134_v47  ;;  %2802 = vmatprep.mubr.bf16.mxu1 %v4136_v49 }
 0x593   : > { %2787 = vmatmul.mubr.bf16.gmra.mrb[12].mxu0 %v4148_v51  ;;  %2803 = vmatmul.mubr.bf16.gmra.mrb[12].mxu1 %v4150_v55 }
 0x64e   : > { %v2776_v17 = vpop.f32.mrb[0].mxu0  ;;  %v2792_v18 = vpop.f32.mrb[0].mxu1 }
 0x64f   : > { %v1913_v31 = vpop.f32.mrb[1].mxu0  ;;  %v1977_v19 = vpop.f32.mrb[1].mxu1 }
 0x650   : > { %v2777_v20 = vpop.f32.mrb[2].mxu0  ;;  %v2793_v35 = vpop.f32.mrb[2].mxu1 }
 0x651   : > { %v2041_v36 = vpack.c.bf16 %v2777_v20, %v2776_v17  ;;  %v2049_v21 = vpack.c.bf16 %v2793_v35, %v2792_v18  ;;  %v1916_v22 = vpop.f32.mrb[3].mxu0  ;;  %v1980_v37 = vpop.f32.mrb[3].mxu1 }
 0x652   : > { %v2040_v38 = vpack.c.bf16 %v1916_v22, %v1913_v31  ;;  %v2048_v23 = vpack.c.bf16 %v1980_v37, %v1977_v19 }
 0x653   : > { %2061 = vst [vmem:[#allocation2 + $0x8] sm:$0xff] %v2041_v36  ;;  %2069 = vst [vmem:[#allocation2 + $0x48] sm:$0xff] %v2049_v21 }
 0x654   : > { %2060 = vst [vmem:[#allocation2] sm:$0xff] %v2040_v38  ;;  %2068 = vst [vmem:[#allocation2 + $0x40] sm:$0xff] %v2048_v23 }
 0x656   : > { %v2780_v24 = vpop.f32.mrb[4].mxu0  ;;  %v2796_v39 = vpop.f32.mrb[4].mxu1 }
 0x657   : > { %v1929_v40 = vpop.f32.mrb[5].mxu0  ;;  %v1993_v25 = vpop.f32.mrb[5].mxu1 }
 0x658   : > { %v2781_v26 = vpop.f32.mrb[6].mxu0  ;;  %v2797_v3 = vpop.f32.mrb[6].mxu1 }
 0x659   : > { %v2043_v5 = vpack.c.bf16 %v2781_v26, %v2780_v24  ;;  %v2051_v43 = vpack.c.bf16 %v2797_v3, %v2796_v39  ;;  %v1932_v44 = vpop.f32.mrb[7].mxu0  ;;  %v1996_v14 = vpop.f32.mrb[7].mxu1 }
 0x65a   : > { %v2042_v60 = vpack.c.bf16 %v1932_v44, %v1929_v40  ;;  %v2050_v7 = vpack.c.bf16 %v1996_v14, %v1993_v25 }
 0x65b   : > { %2063 = vst [vmem:[#allocation2 + $0x18] sm:$0xff] %v2043_v5  ;;  %2071 = vst [vmem:[#allocation2 + $0x58] sm:$0xff] %v2051_v43 }
 0x65c   : > { %2062 = vst [vmem:[#allocation2 + $0x10] sm:$0xff] %v2042_v60  ;;  %2070 = vst [vmem:[#allocation2 + $0x50] sm:$0xff] %v2050_v7 }
 0x65e   : > { %v2784_v30 = vpop.f32.mrb[8].mxu0  ;;  %v2800_v57 = vpop.f32.mrb[8].mxu1 }
 0x65f   : > { %v1945_v58 = vpop.f32.mrb[9].mxu0  ;;  %v2009_v62 = vpop.f32.mrb[9].mxu1 }
 0x660   : > { %v2785_v63 = vpop.f32.mrb[10].mxu0  ;;  %v2801_v12 = vpop.f32.mrb[10].mxu1 }
 0x661   : > { %v2045_v29 = vpack.c.bf16 %v2785_v63, %v2784_v30  ;;  %v2053_v32 = vpack.c.bf16 %v2801_v12, %v2800_v57  ;;  %v1948_v46 = vpop.f32.mrb[11].mxu0  ;;  %v2012_v53 = vpop.f32.mrb[11].mxu1 }
 0x662   : > { %v2044_v54 = vpack.c.bf16 %v1948_v46, %v1945_v58  ;;  %v2052_v9 = vpack.c.bf16 %v2012_v53, %v2009_v62 }
 0x663   : > { %2065 = vst [vmem:[#allocation2 + $0x28] sm:$0xff] %v2045_v29  ;;  %2073 = vst [vmem:[#allocation2 + $0x68] sm:$0xff] %v2053_v32 }
 0x664   : > { %2064 = vst [vmem:[#allocation2 + $0x20] sm:$0xff] %v2044_v54  ;;  %2072 = vst [vmem:[#allocation2 + $0x60] sm:$0xff] %v2052_v9 }
 0x666   : > { %v2788_v48 = vpop.f32.mrb[12].mxu0  ;;  %v2804_v13 = vpop.f32.mrb[12].mxu1 }
 0x667   : > { %v1961_v15 = vpop.f32.mrb[13].mxu0  ;;  %v2025_v11 = vpop.f32.mrb[13].mxu1 }
 0x668   : > { %v2789_v8 = vpop.f32.mrb[14].mxu0  ;;  %v2805_v56 = vpop.f32.mrb[14].mxu1 }
 0x669   : > { %v2047_v1 = vpack.c.bf16 %v2789_v8, %v2788_v48  ;;  %v2055_v45 = vpack.c.bf16 %v2805_v56, %v2804_v13  ;;  %v1964_v16 = vpop.f32.mrb[15].mxu0  ;;  %v2028_v59 = vpop.f32.mrb[15].mxu1 }
 0x66a   : > { %v2046_v61 = vpack.c.bf16 %v1964_v16, %v1961_v15  ;;  %v2054_v4 = vpack.c.bf16 %v2028_v59, %v2025_v11 }
 0x66b   : > { %2067 = vst [vmem:[#allocation2 + $0x38] sm:$0xff] %v2047_v1  ;;  %2075 = vst [vmem:[#allocation2 + $0x78] sm:$0xff] %v2055_v45 }
 0x66c   : > { %2066 = vst [vmem:[#allocation2 + $0x30] sm:$0xff] %v2046_v61  ;;  %2074 = vst [vmem:[#allocation2 + $0x70] sm:$0xff] %v2054_v4 }
 0x66d PF: > { %p2384_p6 = scmp.ne.s32.totalorder %s3289_s24, 3 }
 0x66e   : > { %2688 = vmatprep.subr.bf16.mxu0 (!%p2384_p6), %v4040_v42  ;;  %v2080_v17 = vld [vmem:[#allocation9] sm:$0xff] (!%p2384_p6) }
 0x66f   : > { %2078 = sbr.rel (%p2384_p6) target bundleno = 1896 (0x768), region = 92  ;;  %2689 = vmatpush3.bf16.msra.mxu0 (!%p2384_p6), %v4038_v41  ;;  %v2386_v18 = vcombine.high (!%p2384_p6), %v2080_v17, %v2080_v17  ;;  %v2385_v41 = vcombine.low (!%p2384_p6), %v2080_v17, %v2080_v17 }
 0x670   : > { %2690 = vmatprep.subr.bf16.mxu0 (!%p2384_p6), %v4056_v50 }
 0x671   : > { %2120 = vmatprep.mubr.bf16.mxu0 (!%p2384_p6), %v2386_v18 }
 0x673   : > { %2691 = vmatpush3.bf16.msra.mxu0 (!%p2384_p6), %v4054_v6  ;;  %v2079_v6 = vld [vmem:[#allocation12] sm:$0xff] (!%p2384_p6) }
 0x674   : > { %2692 = vmatprep.subr.bf16.mxu0 (!%p2384_p6), %v4074_v28 }
 0x677   : > { %2693 = vmatpush3.bf16.msra.mxu0 %v4072_v27 }
 0x678   : > { %2694 = vmatprep.subr.bf16.mxu0 %v4088_v0 }
 0x67b   : > { %2695 = vmatpush3.bf16.msra.mxu0 %v4086_v52 }
 0x67c   : > { %2696 = vmatprep.subr.bf16.mxu0 %v4104_v2 }
 0x67f   : > { %2697 = vmatpush3.bf16.msra.mxu0 %v4102_v10 }
 0x680   : > { %2698 = vmatprep.subr.bf16.mxu0 %v4122_v34 }
 0x683   : > { %2699 = vmatpush3.bf16.msra.mxu0 %v4120_v33 }
 0x684   : > { %2700 = vmatprep.subr.bf16.mxu0 %v4136_v49 }
 0x687   : > { %2701 = vmatpush3.bf16.msra.mxu0 %v4134_v47 }
 0x688   : > { %2702 = vmatprep.subr.bf16.mxu0 %v4150_v55 }
 0x68b   : > { %2703 = vmatpush3.bf16.msra.mxu0 %v4148_v51 }
 0x68e   : > { %2121 = vmatmul.mubr.bf16.vlgmr.msra.gmra.mrb[0].mxu0 %v2385_v41 }
 0x761   : > { %v2704_v42 = vpop.f32.mrb[0].mxu0 }
 0x762   : > { %v2705_v50 = vpop.f32.mrb[1].mxu0 }
 0x763   : > { %v2706_v27 = vadd.f32 %v2705_v50, %v2704_v42  ;;  %v2707_v28 = vpop.f32.mrb[2].mxu0 }
 0x764   : > { %v2708_v52 = vpop.f32.mrb[3].mxu0 }
 0x765   : > { %v2128_v0 = vadd.f32 %v2706_v27, %v2079_v6 }
 0x767   : > { %2129 = vst [vmem:[#allocation12] sm:$0xff] %v2128_v0 }
 0x768 PF: > { %p2914_p5 = scmp.eq.s32.totalorder %s3384_s27, 3  ;;  %s3309_s24 = smov [#allocation12]  }
 0x769   : > { %s2137_s7 = sshll.u32 %s3309_s24, 4  ;;  %s2138_s7 = int_to_ptr.vmem [resolvable:$true] %s2137_s7 }
 0x76a   : > { %s3177_s13 = scalar_lea.vmem %s2138_s7, 128  ;;  %p3184_p11 = scmp.lt.s32.totalorder %s2138_s7, %s2138_s7 }
 0x76b   : > { %p3178_p13 = scmp.ne.s32.totalorder %s2138_s7, %s3177_s13  ;;  %p3185_p9 = scmp.lt.s32.totalorder %s3177_s13, %s3177_s13 }
 0x76d   : > { %p3179_p7 = pnand %p3178_p13, %p2914_p5  ;;  %p3186_p0 = por %p3185_p9, %p3184_p11 }
 0x76f   : > { %p3180_p4 = pneg %p3179_p7 }
 0x771   : > { %p3187_p3 = pnand %p3186_p0, %p3180_p4 }
 0x773   : > { %3190 = shalt.err (!%p3187_p3)
}
 0x774   : > { %s4328_s0 = sld [smem:[#allocation30_spill]] }
 0x77a   : > { %s3191_s12 = scalar_lea.hbm %s4328_s0, 128 }
 0x77b   : > { %p3192_p2 = scmp.ne.s32.totalorder %s4328_s0, %s3191_s12  ;;  %p3197_p12 = scmp.lt.u32.totalorder %s3191_s12, %s4328_s0 }
 0x77d   : > { %p3193_p10 = pnand %p3192_p2, %p2914_p5 }
 0x77f   : > { %p3194_p1 = pneg %p3193_p10 }
 0x781   : > { %p3199_p8 = pnand %p3197_p12, %p3194_p1 }
 0x783   : > { %3202 = shalt.err (!%p3199_p8)
}
 0x784   : > { %2887 = dma.vmem_to_hbm [thread:$0]  (%p2914_p5), %s2138_s7, 128, %s4328_s0, [#allocation6]  }
 0x785   : > { %3260 = dma.done.wait (%p2914_p5), [#allocation6], 128  }
 0x786   : > { %3262 = vsyncadd (%p2914_p5), [#allocation6], 4294967168 }
 0x787 PF: > { %s18_s26 = sadd.s32 1, %s3297_s26   ;;  %s4329_s2 = smov %s3521_s21 }
 0x788   : > { %p15_p6 = scmp.ge.s32.totalorder %s18_s26, 6   ;;  %s4330_s18 = smov %s3269_s19 }
 0x789   : > { %s4331_s19 = smov %s3273_s20  ;;  %s4332_s20 = smov %s3551_s15 }
 0x78a   : > { %s4333_s21 = smov %s3281_s22  ;;  %s4334_s22 = smov %s3285_s23 }
 0x78b   : > { %s4335_s23 = smov %s4329_s2  ;;  %s4336_s24 = smov %s3293_s25 }
 0x78c   : > { %s4337_s25 = smov %s3475_s17  ;;  %17 = sbr.rel (!%p15_p6) target bundleno = 12 (0xc), region = 141 }
 0x793   :  { %2150 = vsyncpa [#allocation5], 1 }
 0x794   :  { %2152 = vsyncpa [#allocation5 + $0x1], 1 }
 0x795   :  { %2153 = vsyncpa [#allocation8], 1 }
 0x796   :  { %2154 = vsyncpa [#allocation6], 1 }
 0x797   :  { %2156 = vsyncpa [#allocation6 + $0x1], 1 }

</bundles_post_ra>
